<compile_context>
chip_gen: v5e
topology: v5e:2x2
jax: 0.10.0
libtpu: 0.0.40
codegen_flags: <defaults>
</compile_context>

<pallas_src>
import functools

import numpy as np

import jax
import jax.numpy as jnp
from jax import lax
from jax.experimental import pallas as pl
from jax.experimental.pallas import tpu as pltpu


# -----------------------------------------------------------------------------
# Static phase bookkeeping for ConvTranspose2d:
#   out[q*s + r] += x[q + d - l] * W[..., a + s*l]   with a=(r+p)%s, d=(r+p-a)//s,
#   l = 0..ceil((K-a)/s)-1  (taps with a + s*l < K).
# -----------------------------------------------------------------------------
def _phase_taps(K, s, p):
    phases = []
    for r in range(s):
        a = (r + p) % s
        d = (r + p - a) // s
        taps = []
        if a < K:
            for l in range(-(-(K - a) // s)):
                taps.append((a + s * l, d - l))          # (kernel tap, input offset)
        phases.append(taps)
    return phases


# -----------------------------------------------------------------------------
# Fused kernel: build padded bf16 triplane in VMEM (t == 0), then one phase-packed
# im2col MXU matmul per output-row tile.
# -----------------------------------------------------------------------------
def _fused_kernel(x_ref, w_ref, b_ref, o_ref, xpad_ref, *,
                  H, w3, C, Cin3, Cout, s, TQ, Wq, nrow, ncol,
                  row_write, col_write):
    t = pl.program_id(1)

    # ---- build the zero-padded bf16 triplane for this batch item (once per n) -------
    @pl.when(t == 0)
    def _build_triplane():
        xpad_ref[...] = jnp.zeros_like(xpad_ref)              # padding border -> 0
        xv = x_ref[0].astype(jnp.float32)                     # (H, W, C) channels-last
        p0 = xv[:, 0 * w3:1 * w3, :]
        p1 = xv[:, 1 * w3:2 * w3, :]
        p2 = xv[:, 2 * w3:3 * w3, :]
        bf = xpad_ref.dtype
        # means in f32 (matches the reference), broadcast/concat in bf16 (halves vregs)
        pb = [v.astype(bf) for v in (p0, p1, p2)]
        mw = [jnp.broadcast_to(jnp.mean(v, axis=1, keepdims=True).astype(bf), (H, w3, C))
              for v in (p0, p1, p2)]                          # mean over plane width
        mh = [jnp.broadcast_to(jnp.mean(v, axis=0, keepdims=True).astype(bf), (H, w3, C))
              for v in (p0, p1, p2)]                          # mean over height
        blocks = [
            jnp.concatenate([pb[0], mh[1], mw[2]], axis=-1),  # fea_yx_3d_aware
            jnp.concatenate([pb[1], mh[0], mh[2]], axis=-1),  # fea_zx_3d_aware
            jnp.concatenate([pb[2], mw[0], mw[1]], axis=-1),  # fea_yz_3d_aware
        ]
        tri = jnp.concatenate(blocks, axis=1)                 # (H, W, 3C) bf16
        it0, r_lo, nr = row_write
        jt0, c_lo, nc = col_write
        xpad_ref[it0:it0 + nr, jt0:jt0 + nc, :] = tri[r_lo:r_lo + nr, c_lo:c_lo + nc, :]

    # ---- phase-packed transposed conv for this row tile ------------------------------
    q0 = pl.multiple_of(t * TQ, TQ)
    xs = xpad_ref[pl.ds(q0, TQ + nrow - 1), :, :]             # (TQ+nrow-1, Wpad, 3C) bf16

    # im2col over the UNION of (row-offset, col-offset) taps of all s*s phases
    # -> ONE MXU matmul per tile.  (If profiling shows the lane-concats bind on
    #    vst/XLU, switch to per-tap matmuls accumulating into an f32 scratch.)
    pieces = [xs[jr:jr + TQ, jc:jc + Wq, :]
              for jr in range(nrow) for jc in range(ncol)]
    patch = pieces[0] if len(pieces) == 1 else jnp.concatenate(pieces, axis=-1)
    acc = jnp.dot(patch.reshape(TQ * Wq, nrow * ncol * Cin3), w_ref[...],
                  preferred_element_type=jnp.float32)         # (TQ*Wq, s*s*Cout) f32
    acc = acc + b_ref[...]                                    # bias added once
    o_ref[0] = acc.reshape(TQ, Wq, s * s * Cout).astype(o_ref.dtype)


# -----------------------------------------------------------------------------
# Wrapper: static geometry, packed weight, pallas_call, free/fused output relayout.
# -----------------------------------------------------------------------------
@functools.partial(jax.jit,
                   static_argnames=("stride", "padding", "output_padding", "row_tile"))
def conv3d_aware_transpose_forward(x, weight_t, bias, *, stride, padding,
                                   output_padding, row_tile=None):
    """x: (N, C, H, W) with W = 3*w3; weight_t: (3C, Cout, K, K) (ConvTranspose2d layout);
    bias: (Cout,).  Returns NCHW float32, matching the PyTorch module."""
    N, C, H, W = x.shape
    assert W % 3 == 0, "triplane width must be divisible by 3"
    w3 = W // 3
    Cin3, Cout, K, K2 = weight_t.shape
    assert Cin3 == 3 * C and K == K2
    s, p, op = stride, padding, output_padding

    Hout = (H - 1) * s - 2 * p + K + op
    Wout = (W - 1) * s - 2 * p + K + op
    Hq = -(-Hout // s)                                  # output-phase rows
    Wq = -(-Wout // s)                                  # output-phase cols

    # output-row tiling (second grid axis)
    TQ = Hq if row_tile is None else max(1, min(row_tile, Hq))
    T = -(-Hq // TQ)
    Hq_ceil = T * TQ                                    # padded up; cropped at the end

    # square kernel + identical stride/padding on both dims -> shared phase table
    phases = _phase_taps(K, s, p)
    offs = [d for taps in phases for (_, d) in taps]
    dmin, dmax = min(offs), max(offs)
    nrow = ncol = dmax - dmin + 1                       # union of input offsets

    # padded-triplane geometry (all static Python ints)
    Hpad = Hq_ceil + nrow - 1
    Wpad = Wq + ncol - 1
    r_lo, r_hi = max(0, dmin), min(H - 1, Hq_ceil - 1 + dmax)
    c_lo, c_hi = max(0, dmin), min(W - 1, Wq - 1 + dmax)
    assert r_hi >= r_lo and c_hi >= c_lo
    row_write = (r_lo - dmin, r_lo, r_hi - r_lo + 1)
    col_write = (c_lo - dmin, c_lo, c_hi - c_lo + 1)

    # ---- packed matmul weight: rows (jr, jc, cin), cols (ra, rb, cout) ---------------
    taps = []
    for ra, rtaps in enumerate(phases):
        for (kh, dr) in rtaps:
            for rb, ctaps in enumerate(phases):
                for (kw, dc) in ctaps:
                    taps.append((dr - dmin, dc - dmin, ra, rb, kh, kw))
    taps = np.asarray(taps, dtype=np.int32)
    w_gath = jnp.moveaxis(weight_t[:, :, taps[:, 4], taps[:, 5]], -1, 0)  # (T, 3C, Cout)
    wfull = jnp.zeros((nrow, ncol, s, s, Cin3, Cout), weight_t.dtype)
    wfull = wfull.at[taps[:, 0], taps[:, 1], taps[:, 2], taps[:, 3]].set(w_gath)
    KC = nrow * ncol * Cin3
    ssCout = s * s * Cout
    wmat = jnp.transpose(wfull, (0, 1, 4, 2, 3, 5)).reshape(KC, ssCout).astype(jnp.bfloat16)
    bias_t = jnp.tile(bias.astype(jnp.float32), (s * s,)).reshape(1, ssCout)

    # channels-last view of the (small) input; the only XLA layout op on the input side
    x4 = jnp.transpose(x, (0, 2, 3, 1))                 # (N, H, W, C)

    kern = functools.partial(
        _fused_kernel, H=H, w3=w3, C=C, Cin3=Cin3, Cout=Cout, s=s, TQ=TQ, Wq=Wq,
        nrow=nrow, ncol=ncol, row_write=row_write, col_write=col_write)

    out = pl.pallas_call(
        kern,
        out_shape=jax.ShapeDtypeStruct((N, Hq_ceil, Wq, ssCout), jnp.bfloat16),
        grid=(N, T),
        in_specs=[
            pl.BlockSpec((1, H, W, C), lambda n, t: (n, 0, 0, 0)),
            pl.BlockSpec((KC, ssCout), lambda n, t: (0, 0)),
            pl.BlockSpec((1, ssCout), lambda n, t: (0, 0)),
        ],
        out_specs=pl.BlockSpec((1, TQ, Wq, ssCout), lambda n, t: (n, t, 0, 0)),
        scratch_shapes=[pltpu.VMEM((Hpad, Wpad, Cin3), jnp.bfloat16)],
        compiler_params=pltpu.CompilerParams(
            dimension_semantics=("parallel", "arbitrary"),
            vmem_limit_bytes=48 * 1024 * 1024),        # < 64 MiB -> safe on v7x too
    )(x4, wmat, bias_t)

    # Free reshape, then ONE fused bf16-read transpose that performs the phase
    # interleave, the NCHW permute the module requires, and the f32 cast.
    out6 = out.reshape(N, Hq_ceil, Wq, s, s, Cout)            # (n, q, m, ra, rb, co)
    out_nchw = jnp.transpose(out6, (0, 5, 1, 3, 2, 4)).reshape(
        N, Cout, Hq_ceil * s, Wq * s)
    return out_nchw[:, :, :Hout, :Wout].astype(jnp.float32)


# -----------------------------------------------------------------------------
# Pure-JAX reference (same bf16 quantization point as the kernel)
# -----------------------------------------------------------------------------
def _reference_forward(x, weight_t, bias, *, stride, padding, output_padding):
    N, C, H, W = x.shape
    w3 = W // 3
    fea_yx, fea_zx, fea_yz = x[..., :w3], x[..., w3:2 * w3], x[..., 2 * w3:]
    mw = lambda a: jnp.broadcast_to(jnp.mean(a, axis=3, keepdims=True), a.shape)
    mh = lambda a: jnp.broadcast_to(jnp.mean(a, axis=2, keepdims=True), a.shape)
    blk_yx = jnp.concatenate([fea_yx, mh(fea_zx), mw(fea_yz)], axis=1)
    blk_zx = jnp.concatenate([fea_zx, mh(fea_yx), mh(fea_yz)], axis=1)
    blk_yz = jnp.concatenate([fea_yz, mw(fea_yx), mw(fea_zx)], axis=1)
    tri = jnp.concatenate([blk_yx, blk_zx, blk_yz], axis=3)

    K = weight_t.shape[2]
    s, p, op = stride, padding, output_padding
    plo, phi = K - 1 - p, K - 1 - p + op
    assert plo >= 0, "reference path requires padding <= kernel_size - 1"
    k_conv = jnp.transpose(weight_t[:, :, ::-1, ::-1], (2, 3, 0, 1)).astype(jnp.bfloat16)
    tri_nhwc = jnp.transpose(tri, (0, 2, 3, 1)).astype(jnp.bfloat16)
    out_nhwc = lax.conv_general_dilated(
        tri_nhwc, k_conv, window_strides=(1, 1),
        padding=((plo, phi), (plo, phi)), lhs_dilation=(s, s),
        dimension_numbers=("NHWC", "HWIO", "NHWC"),
        preferred_element_type=jnp.float32) + bias.astype(jnp.float32)
    return jnp.transpose(out_nhwc, (0, 3, 1, 2))


if __name__ == "__main__":
    key = jax.random.PRNGKey(0)
    kx, kw = jax.random.split(key, 2)

    # small shapes consistent with the module: triplane width = 3 * plane_width
    N, C, H, w3 = 2, 4, 16, 8
    W = 3 * w3
    Cout = 8

    x = jax.random.normal(kx, (N, C, H, W), jnp.float32)

    # (K, stride, padding, output_padding): exercises unequal per-phase tap counts,
    # top/bottom/right zero halos, row-tile cropping (config 3) and K > 2*stride.
    configs = [(3, 2, 1, 1), (4, 2, 1, 0), (3, 3, 0, 2), (5, 2, 2, 1)]
    for (K, stride, padding, output_padding) in configs:
        kw_w, kw_b = jax.random.split(jax.random.fold_in(kw, 10 * K + stride), 2)
        weight_t = jax.random.normal(kw_w, (3 * C, Cout, K, K), jnp.float32) * 0.05
        bias = jax.random.normal(kw_b, (Cout,), jnp.float32) * 0.05

        out = conv3d_aware_transpose_forward(
            x, weight_t, bias, stride=stride, padding=padding,
            output_padding=output_padding, row_tile=8)       # row_tile=8 -> multi-tile grid
        out = jax.block_until_ready(out)

        H_out = (H - 1) * stride - 2 * padding + K + output_padding
        W_out = (W - 1) * stride - 2 * padding + K + output_padding
        assert out.shape == (N, Cout, H_out, W_out), out.shape

        ref = _reference_forward(
            x, weight_t, bias,
            stride=stride, padding=padding, output_padding=output_padding)
        err = float(jnp.max(jnp.abs(out - ref)))
        assert err < 1e-2, (K, stride, padding, output_padding, err)

    print("KERNEL_OK")
</pallas_src>

<mosaic_0001>
module attributes {stable_mosaic.version = 11 : i64} {
  func.func @_fused_kernel(%arg0: i32, %arg1: i32, %arg2: memref<1x16x24x4xf32, #tpu.memory_space<vmem>>, %arg3: memref<48x32xbf16, #tpu.memory_space<vmem>>, %arg4: memref<1x32xf32, #tpu.memory_space<vmem>>, %arg5: memref<1x8x24x32xbf16, #tpu.memory_space<vmem>>, %arg6: memref<17x25x12xbf16, #tpu.memory_space<vmem>>) attributes {dimension_semantics = [#tpu.dimension_semantics<parallel>, #tpu.dimension_semantics<arbitrary>], iteration_bounds = array<i64: 2, 2>, scalar_prefetch = 0 : i64, scratch_operands = 1 : i64, tpu.core_type = #tpu.core_type<tc>, window_params = [{transform_indices = @transform_0, window_bounds = array<i64: 1, 16, 24, 4>}, {pipeline_mode = #tpu.pipeline_mode<synchronous>, transform_indices = @transform_1, window_bounds = array<i64: 48, 32>}, {pipeline_mode = #tpu.pipeline_mode<synchronous>, transform_indices = @transform_2, window_bounds = array<i64: 1, 32>}, {transform_indices = @transform_3, window_bounds = array<i64: 1, 8, 24, 32>}]} {
    %c0_i32 = arith.constant 0 : i32
    %0 = arith.cmpi eq, %arg1, %c0_i32 : i32
    %1 = arith.extui %0 : i1 to i32
    %c0_i32_0 = arith.constant 0 : i32
    %2 = arith.cmpi ne, %1, %c0_i32_0 : i32
    scf.if %2 {
      %cst_10 = arith.constant 0.000000e+00 : bf16
      %23 = vector.broadcast %cst_10 : bf16 to vector<17x25x12xbf16>
      %c0_11 = arith.constant 0 : index
      %c0_12 = arith.constant 0 : index
      %c0_13 = arith.constant 0 : index
      %24 = vector.load %arg6[%c0_11, %c0_12, %c0_13] : memref<17x25x12xbf16, #tpu.memory_space<vmem>>, vector<17x25x12xbf16>
      tpu.vector_store %arg6[%c0_11, %c0_12, %c0_13], %23 {strides = array<i32>} : memref<17x25x12xbf16, #tpu.memory_space<vmem>>, vector<17x25x12xbf16>,
      %c0_14 = arith.constant 0 : index
      %c0_15 = arith.constant 0 : index
      %c0_16 = arith.constant 0 : index
      %c0_17 = arith.constant 0 : index
      %25 = vector.load %arg2[%c0_14, %c0_15, %c0_16, %c0_17] : memref<1x16x24x4xf32, #tpu.memory_space<vmem>>, vector<1x16x24x4xf32>
      %26 = vector.shape_cast %25 : vector<1x16x24x4xf32> to vector<16x24x4xf32>
      %27 = vector.extract_strided_slice %26 {offsets = [0, 0, 0], sizes = [16, 8, 4], strides = [1, 1, 1]} : vector<16x24x4xf32> to vector<16x8x4xf32>
      %28 = vector.extract_strided_slice %26 {offsets = [0, 8, 0], sizes = [16, 8, 4], strides = [1, 1, 1]} : vector<16x24x4xf32> to vector<16x8x4xf32>
      %29 = vector.extract_strided_slice %26 {offsets = [0, 16, 0], sizes = [16, 8, 4], strides = [1, 1, 1]} : vector<16x24x4xf32> to vector<16x8x4xf32>
      %30 = arith.truncf %27 : vector<16x8x4xf32> to vector<16x8x4xbf16>
      %31 = arith.truncf %28 : vector<16x8x4xf32> to vector<16x8x4xbf16>
      %32 = arith.truncf %29 : vector<16x8x4xf32> to vector<16x8x4xbf16>
      %cst_18 = arith.constant dense<0.000000e+00> : vector<16x4xf32>
      %33 = vector.multi_reduction <add>, %27, %cst_18 [1] : vector<16x8x4xf32> to vector<16x4xf32>
      %34 = vector.shape_cast %33 : vector<16x4xf32> to vector<16x1x4xf32>
      %cst_19 = arith.constant 8.000000e+00 : f32
      %35 = vector.broadcast %cst_19 : f32 to vector<16x1x4xf32>
      %36 = arith.divf %34, %35 : vector<16x1x4xf32>
      %37 = arith.truncf %36 : vector<16x1x4xf32> to vector<16x1x4xbf16>
      %38 = vector.shape_cast %37 : vector<16x1x4xbf16> to vector<16x1x4xbf16>
      %39 = vector.broadcast %38 : vector<16x1x4xbf16> to vector<16x8x4xbf16>
      %cst_20 = arith.constant dense<0.000000e+00> : vector<16x4xf32>
      %40 = vector.multi_reduction <add>, %28, %cst_20 [1] : vector<16x8x4xf32> to vector<16x4xf32>
      %41 = vector.shape_cast %40 : vector<16x4xf32> to vector<16x1x4xf32>
      %cst_21 = arith.constant 8.000000e+00 : f32
      %42 = vector.broadcast %cst_21 : f32 to vector<16x1x4xf32>
      %43 = arith.divf %41, %42 : vector<16x1x4xf32>
      %44 = arith.truncf %43 : vector<16x1x4xf32> to vector<16x1x4xbf16>
      %45 = vector.shape_cast %44 : vector<16x1x4xbf16> to vector<16x1x4xbf16>
      %46 = vector.broadcast %45 : vector<16x1x4xbf16> to vector<16x8x4xbf16>
      %cst_22 = arith.constant dense<0.000000e+00> : vector<16x4xf32>
      %47 = vector.multi_reduction <add>, %29, %cst_22 [1] : vector<16x8x4xf32> to vector<16x4xf32>
      %48 = vector.shape_cast %47 : vector<16x4xf32> to vector<16x1x4xf32>
      %cst_23 = arith.constant 8.000000e+00 : f32
      %49 = vector.broadcast %cst_23 : f32 to vector<16x1x4xf32>
      %50 = arith.divf %48, %49 : vector<16x1x4xf32>
      %51 = arith.truncf %50 : vector<16x1x4xf32> to vector<16x1x4xbf16>
      %52 = vector.shape_cast %51 : vector<16x1x4xbf16> to vector<16x1x4xbf16>
      %53 = vector.broadcast %52 : vector<16x1x4xbf16> to vector<16x8x4xbf16>
      %cst_24 = arith.constant dense<0.000000e+00> : vector<8x4xf32>
      %54 = vector.multi_reduction <add>, %27, %cst_24 [0] : vector<16x8x4xf32> to vector<8x4xf32>
      %55 = vector.shape_cast %54 : vector<8x4xf32> to vector<1x8x4xf32>
      %cst_25 = arith.constant 1.600000e+01 : f32
      %56 = vector.broadcast %cst_25 : f32 to vector<1x8x4xf32>
      %57 = arith.divf %55, %56 : vector<1x8x4xf32>
      %58 = arith.truncf %57 : vector<1x8x4xf32> to vector<1x8x4xbf16>
      %59 = vector.shape_cast %58 : vector<1x8x4xbf16> to vector<1x8x4xbf16>
      %60 = vector.broadcast %59 : vector<1x8x4xbf16> to vector<16x8x4xbf16>
      %cst_26 = arith.constant dense<0.000000e+00> : vector<8x4xf32>
      %61 = vector.multi_reduction <add>, %28, %cst_26 [0] : vector<16x8x4xf32> to vector<8x4xf32>
      %62 = vector.shape_cast %61 : vector<8x4xf32> to vector<1x8x4xf32>
      %cst_27 = arith.constant 1.600000e+01 : f32
      %63 = vector.broadcast %cst_27 : f32 to vector<1x8x4xf32>
      %64 = arith.divf %62, %63 : vector<1x8x4xf32>
      %65 = arith.truncf %64 : vector<1x8x4xf32> to vector<1x8x4xbf16>
      %66 = vector.shape_cast %65 : vector<1x8x4xbf16> to vector<1x8x4xbf16>
      %67 = vector.broadcast %66 : vector<1x8x4xbf16> to vector<16x8x4xbf16>
      %cst_28 = arith.constant dense<0.000000e+00> : vector<8x4xf32>
      %68 = vector.multi_reduction <add>, %29, %cst_28 [0] : vector<16x8x4xf32> to vector<8x4xf32>
      %69 = vector.shape_cast %68 : vector<8x4xf32> to vector<1x8x4xf32>
      %cst_29 = arith.constant 1.600000e+01 : f32
      %70 = vector.broadcast %cst_29 : f32 to vector<1x8x4xf32>
      %71 = arith.divf %69, %70 : vector<1x8x4xf32>
      %72 = arith.truncf %71 : vector<1x8x4xf32> to vector<1x8x4xbf16>
      %73 = vector.shape_cast %72 : vector<1x8x4xbf16> to vector<1x8x4xbf16>
      %74 = vector.broadcast %73 : vector<1x8x4xbf16> to vector<16x8x4xbf16>
      %75 = tpu.concatenate %30, %67, %53 in 2 : vector<16x8x4xbf16>, vector<16x8x4xbf16>, vector<16x8x4xbf16> -> vector<16x8x12xbf16>
      %76 = tpu.concatenate %31, %60, %74 in 2 : vector<16x8x4xbf16>, vector<16x8x4xbf16>, vector<16x8x4xbf16> -> vector<16x8x12xbf16>
      %77 = tpu.concatenate %32, %39, %46 in 2 : vector<16x8x4xbf16>, vector<16x8x4xbf16>, vector<16x8x4xbf16> -> vector<16x8x12xbf16>
      %78 = tpu.concatenate %75, %76, %77 in 1 : vector<16x8x12xbf16>, vector<16x8x12xbf16>, vector<16x8x12xbf16> -> vector<16x24x12xbf16>
      %c0_30 = arith.constant 0 : index
      %c0_31 = arith.constant 0 : index
      %c0_32 = arith.constant 0 : index
      %79 = vector.load %arg6[%c0_30, %c0_31, %c0_32] : memref<17x25x12xbf16, #tpu.memory_space<vmem>>, vector<16x24x12xbf16>
      tpu.vector_store %arg6[%c0_30, %c0_31, %c0_32], %78 {strides = array<i32>} : memref<17x25x12xbf16, #tpu.memory_space<vmem>>, vector<16x24x12xbf16>,
    } else {
    }
    %c8_i32 = arith.constant 8 : i32
    %3 = arith.muli %arg1, %c8_i32 : i32
    %4 = tpu.assume_multiple %3, 8 : i32
    %5 = arith.index_cast %4 : i32 to index
    %c0 = arith.constant 0 : index
    %c0_1 = arith.constant 0 : index
    %6 = vector.load %arg6[%5, %c0, %c0_1] : memref<17x25x12xbf16, #tpu.memory_space<vmem>>, vector<9x25x12xbf16>
    %7 = vector.extract_strided_slice %6 {offsets = [0, 0, 0], sizes = [8, 24, 12], strides = [1, 1, 1]} : vector<9x25x12xbf16> to vector<8x24x12xbf16>
    %8 = vector.extract_strided_slice %6 {offsets = [0, 1, 0], sizes = [8, 24, 12], strides = [1, 1, 1]} : vector<9x25x12xbf16> to vector<8x24x12xbf16>
    %9 = vector.extract_strided_slice %6 {offsets = [1, 0, 0], sizes = [8, 24, 12], strides = [1, 1, 1]} : vector<9x25x12xbf16> to vector<8x24x12xbf16>
    %10 = vector.extract_strided_slice %6 {offsets = [1, 1, 0], sizes = [8, 24, 12], strides = [1, 1, 1]} : vector<9x25x12xbf16> to vector<8x24x12xbf16>
    %11 = tpu.concatenate %7, %8, %9, %10 in 2 : vector<8x24x12xbf16>, vector<8x24x12xbf16>, vector<8x24x12xbf16>, vector<8x24x12xbf16> -> vector<8x24x48xbf16>
    %12 = vector.shape_cast %11 : vector<8x24x48xbf16> to vector<192x48xbf16>
    %c0_2 = arith.constant 0 : index
    %c0_3 = arith.constant 0 : index
    %13 = vector.load %arg3[%c0_2, %c0_3] : memref<48x32xbf16, #tpu.memory_space<vmem>>, vector<48x32xbf16>
    %cst = arith.constant dense<0.000000e+00> : vector<192x32xf32>
    %14 = tpu.matmul %12, %13, %cst {dimension_numbers = #tpu.dot_dimension_numbers<[1], [0], [0], [1], [0, 0, 1, 1], [], []>} : vector<192x48xbf16>, vector<48x32xbf16>, vector<192x32xf32> -> vector<192x32xf32>
    %c0_4 = arith.constant 0 : index
    %c0_5 = arith.constant 0 : index
    %15 = vector.load %arg4[%c0_4, %c0_5] : memref<1x32xf32, #tpu.memory_space<vmem>>, vector<1x32xf32>
    %16 = vector.broadcast %15 : vector<1x32xf32> to vector<192x32xf32>
    %17 = arith.addf %14, %16 : vector<192x32xf32>
    %18 = vector.shape_cast %17 : vector<192x32xf32> to vector<8x24x32xf32>
    %19 = arith.truncf %18 : vector<8x24x32xf32> to vector<8x24x32xbf16>
    %c0_6 = arith.constant 0 : index
    %c0_7 = arith.constant 0 : index
    %c0_8 = arith.constant 0 : index
    %c0_9 = arith.constant 0 : index
    %20 = vector.load %arg5[%c0_6, %c0_7, %c0_8, %c0_9] : memref<1x8x24x32xbf16, #tpu.memory_space<vmem>>, vector<1x8x24x32xbf16>
    %21 = vector.shape_cast %20 : vector<1x8x24x32xbf16> to vector<8x24x32xbf16>
    %22 = vector.shape_cast %19 : vector<8x24x32xbf16> to vector<1x8x24x32xbf16>
    tpu.vector_store %arg5[%c0_6, %c0_7, %c0_8, %c0_9], %22 {strides = array<i32>} : memref<1x8x24x32xbf16, #tpu.memory_space<vmem>>, vector<1x8x24x32xbf16>,
    return
  }
  func.func @transform_0(%arg0: i32, %arg1: i32) -> (i32, i32, i32, i32) {
    %c0_i32 = arith.constant 0 : i32
    %c0_i32_0 = arith.constant 0 : i32
    %c0_i32_1 = arith.constant 0 : i32
    %c0_i32_2 = arith.constant 0 : i32
    return %arg0, %c0_i32, %c0_i32_0, %c0_i32_1 : i32, i32, i32, i32
  }
  func.func @transform_1(%arg0: i32, %arg1: i32) -> (i32, i32) {
    %c0_i32 = arith.constant 0 : i32
    %c0_i32_0 = arith.constant 0 : i32
    %c0_i32_1 = arith.constant 0 : i32
    return %c0_i32, %c0_i32_0 : i32, i32
  }
  func.func @transform_2(%arg0: i32, %arg1: i32) -> (i32, i32) {
    %c0_i32 = arith.constant 0 : i32
    %c0_i32_0 = arith.constant 0 : i32
    %c0_i32_1 = arith.constant 0 : i32
    return %c0_i32, %c0_i32_0 : i32, i32
  }
  func.func @transform_3(%arg0: i32, %arg1: i32) -> (i32, i32, i32, i32) {
    %c0_i32 = arith.constant 0 : i32
    %c0_i32_0 = arith.constant 0 : i32
    %c0_i32_1 = arith.constant 0 : i32
    return %arg0, %arg1, %c0_i32, %c0_i32_0 : i32, i32, i32, i32
  }
}

</mosaic_0001>

<bundles_post_ra>
// kernel: tile.9
= control target key start
LH: loop header
LB: loop body
LE: loop exit
PB: predicated region body
PF: predicated region fallthrough
CT: control target
= control target key end

     0   :  { %s37_s8 = smov 8   ;;  %s38_s9 = smov 16   ;;  %vm7_vm0 = vcmask 64512   ;;  %vm13_vm1 = vcmask 261312   ;;  %vm19_vm2 = vcmask 195712   ;;  %vm25_vm3 = vcmask 130112   ;;  %s55_s0 = inlined_call_operand.vmem [shape: f32[4,8], index: 0, kind: input, shape index: {}]   ;;  %s56_s1 = inlined_call_operand.vmem [shape: f32[1,32], index: 1, kind: output, shape index: {}]  }
   0x1   :  { %v4_v0 = vld [vmem:[%s55_s0] sm:$0xf]  ;;  %s36_s0 = smov 24  }
   0x2   :  { %5 = vst [vmem:[#allocation1] sm:$0xf] %v4_v0 }
   0x9   :  { %v10_v1 = vld [vmem:[#allocation1 + $0x3] sm:$0x1]   ;;  %v22_v2 = vld [vmem:[#allocation1 + $0x1] sm:$0x1]   ;;  %v16_v3 = vld [vmem:[#allocation1 + $0x2] sm:$0x1]  }
   0xa   :  { %11 = vrot.lane.b32.xlu0 %v10_v1, %s36_s0  ;;  %23 = vrot.lane.b32.xlu1 %v22_v2, %s37_s8  ;;  %v6_v4 = vld [vmem:[#allocation1] sm:$0x1]  }
   0xb   :  { %8 = vst.msk [vmem:[#allocation0] sm:$0x1] %vm7_vm0, %v6_v4  }
  0x12   :  { %17 = vrot.lane.b32.xlu0 %v16_v3, %s38_s9 }
  0x7c   :  { %v12_v5 = vpop.permute.xlu0 %11   ;;  %v24_v6 = vpop.permute.xlu1 %23  }
  0x7d   :  { %14 = vst.msk [vmem:[#allocation0] sm:$0x1] %vm13_vm1, %v12_v5  }
  0x84   :  { %v18_v7 = vpop.permute.xlu0 %17  }
  0x85   :  { %20 = vst.msk [vmem:[#allocation0] sm:$0x1] %vm19_vm2, %v18_v7  }
  0x86   :  { %26 = vst.msk [vmem:[#allocation0] sm:$0x1] %vm25_vm3, %v24_v6  }
  0x8d   :  { %v29_v8 = vld [vmem:[#allocation0] sm:$0x1] }
  0x8e   :  { %32 = vst [vmem:[%s56_s1] sm:$0x1] %v29_v8 }

// kernel: tile.8
= control target key start
LH: loop header
LB: loop body
LE: loop exit
PB: predicated region body
PF: predicated region fallthrough
CT: control target
= control target key end

     0   :  { %2 = vsyncpa [#allocation1], 0  ;;  %s48_s8 = smov [#allocation0]   ;;  %s65_s0 = inlined_call_operand.hbm [shape: f32[8], index: 0, kind: input, shape index: {}]   ;;  %s66_s1 = inlined_call_operand.vmem [shape: f32[4,8], index: 1, kind: output, shape index: {}]  }
   0x1   :  { %s8_s0 = sshll.u32 %s65_s0, 4  ;;  %s10_s9 = sshll.u32 %s48_s8, 4  ;;  %s9_s0 = int_to_ptr.hbm [resolvable:$true] %s8_s0  ;;  %s11_s9 = int_to_ptr.vmem [resolvable:$true] %s10_s9 }
   0x2   :  { %13 = dma.hbm_to_vmem [thread:$0]  %s9_s0, 16, %s11_s9, [#allocation1]  }
   0x3   :  { %46 = dma.done.wait [#allocation1], 16  }
   0x4   :  { %47 = vsyncadd [#allocation1], 4294967280  ;;  %v18_v0 = vld [vmem:[#allocation0] ss:$0 sm:$0xff] }
   0x5   :  { %19 = vst [vmem:[%s66_s1] sm:$0xf] %v18_v0 }
   0x6   :  { %20 = vsyncpa [#allocation1], 1 }

// kernel: conv3d_aware_transpose_forward.1
= control target key start
LH: loop header
LB: loop body
LE: loop exit
PB: predicated region body
PF: predicated region fallthrough
CT: control target
= control target key end

     0   :  { %s2635_s12 = smov 0   ;;  %s2637_s13 = smov 0   ;;  %s4230_s0 = inlined_call_operand.vmem [shape: f32[2,16,24,4], index: 0, kind: input, shape index: {}]   ;;  %s4231_s1 = inlined_call_operand.vmem [shape: bf16[48,32], index: 1, kind: input, shape index: {}]   ;;  %s4232_s2 = inlined_call_operand.vmem [shape: f32[1,32], index: 2, kind: input, shape index: {}]   ;;  %s4233_s3 = inlined_call_operand.vmem [shape: bf16[2,16,24,32], index: 3, kind: output, shape index: {}]  }
   0x1   :  { %s2639_s14 = smov 0   ;;  %s2641_s15 = smov 0  }
   0x2   :  { %s2643_s16 = smov 0  }
   0x3 LB: > { %s22_s17 = sadd.s32 1, %s2597_s14  ;;  %s25_s18 = sadd.s32 1, %s2601_s15  ;;  %s2605_s16 = sphi %s2643_s16, %s13_s16   ;;  %s2601_s15 = sphi %s2641_s15, %s4311_s15   ;;  %s2597_s14 = sphi %s2639_s14, %s4310_s14   ;;  %s2593_s13 = sphi %s2637_s13, %s4309_s13   ;;  %s2589_s12 = sphi %s2635_s12, %s4308_s12  }
   0x4   : > { %p23_p0 = scmp.ge.s32.totalorder %s22_s17, 2  ;;  %p2402_p1 = scmp.ge.s32.totalorder %s2605_s16, 1 }
   0x5   : > { %p151_p2 = scmp.lt.s32.totalorder %s2605_s16, 5 }
   0x6   : > { %s4313_s17 = smov (%p23_p0, %s22_s17), 0  ;;  %s4315_s18 = smov (!%p23_p0, %s25_s18), %s2601_s15 }
   0x7   : > { %p152_p3 = pnand %p2402_p1, %p151_p2  ;;  %p27_p4 = scmp.ge.s32.totalorder %s4315_s18, 2 }
   0x8   : > { %p180_p5 = scmp.lt.s32.totalorder (!%p152_p3), %s2593_s13, 1  ;;  %s2404_s19 = sshll.u32 (!%p152_p3), %s2589_s12, 3 }
   0x9   : > { %s4317_s18 = smov (%p27_p4, %s4315_s18), 0  ;;  %155 = sbr.rel (%p152_p3) target bundleno = 719 (0x2cf), region = 32 }
   0xa   : > { %p188_p6 = scmp.lt.s32.totalorder (!%p152_p3), %s2404_s19, 15  ;;  %p2406_p7 = scmp.ne.s32.totalorder (!%p152_p3), %s2589_s12, 0 }
   0xe   : > { %s4319_s13 = smov (!%p180_p5, %s2593_s13), 1  ;;  %s4321_s19 = smov (!%p188_p6, %s2404_s19), 15 }
   0xf   : > { %s2495_s20 = smul.u32 384, %s4319_s13 }
  0x10   : > { %s2496_s21 = smul.u32 3, %s4321_s19 }
  0x11   : > { %s2671_s24 = scalar_lea.vmem %s4230_s0, %s2495_s20  ;;  %s2497_s25 = smul.u32 48, %s4319_s13 }
  0x12   : > { %200 = sbr.rel (%p2406_p7) target bundleno = 322 (0x142), region = 36 }
  0x13   : > { %s192_s26 = sadd.s32 %s2497_s25, %s2496_s21 }
  0x14   : > { %s2405_s27 = sshll.u32 %s192_s26, 2 }
  0x15   : > { %s2676_s30 = scalar_lea.vmem %s4233_s3, %s2405_s27 }
  0x17   : > { %v318_v0 = vld [vmem:[%s2671_s24 + $0x58] sm:$0xff]  ;;  %vm403_vm0 = vcmask 31744   ;;  %v312_v1 = vld [vmem:[%s2671_s24 + $0x28] sm:$0xff]  ;;  %v309_v2 = vld [vmem:[%s2671_s24 + $0x10] sm:$0xff]  ;;  %v2607_v3 = vmov 8.0   ;;  %s2608_s4 = smov 8  }
  0x18   : > { %2546 = vrcp.f32 %v2607_v3  ;;  %v2683_v4 = vsel %vm403_vm0, %v318_v0, 0.0  ;;  %v706_v5 = vsel %vm403_vm0, %v312_v1, 0.0  ;;  %v315_v6 = vld [vmem:[%s2671_s24 + $0x40] sm:$0xff]  ;;  %v699_v7 = vsel %vm403_vm0, %v309_v2, 0.0  ;;  %v321_v8 = vld [vmem:[%s2671_s24 + $0x70] sm:$0xff]  ;;  %v324_v9 = vld [vmem:[%s2671_s24 + $0x88] sm:$0xff] }
  0x19   : > { %v721_v10 = vrot.slane %v2683_v4, 4  ;;  %v707_v11 = vrot.slane %v706_v5, 4  ;;  %v700_v12 = vrot.slane %v699_v7, 4  ;;  %v713_v13 = vsel %vm403_vm0, %v315_v6, 0.0  ;;  %v330_v14 = vld [vmem:[%s2671_s24 + $0xb8] sm:$0xff]  ;;  %v327_v47 = vld [vmem:[%s2671_s24 + $0xa0] sm:$0xff] }
  0x1a   : > { %v2694_v15 = vsel %vm403_vm0, %v321_v8, 0.0  ;;  %v714_v16 = vrot.slane %v713_v13, 4  ;;  %v2697_v17 = vsel %vm403_vm0, %v324_v9, 0.0  ;;  %v2703_v24 = vsel %vm403_vm0, %v330_v14, 0.0  ;;  %v333_v48 = vld [vmem:[%s2671_s24 + $0xd0] sm:$0xff]  ;;  %v339_v9 = vld [vmem:[%s2671_s24 + $0x100] sm:$0xff] }
  0x1b   : > { %v722_v18 = vadd.f32 %v721_v10, %v2683_v4  ;;  %v708_v19 = vadd.f32 %v707_v11, %v706_v5  ;;  %v701_v20 = vadd.f32 %v700_v12, %v699_v7  ;;  %v728_v21 = vrot.slane %v2694_v15, 4  ;;  %s2610_s5 = smov 4  }
  0x1c   : > { %v715_v22 = vadd.f32 %v714_v16, %v713_v13  ;;  %v735_v23 = vrot.slane %v2697_v17, 4  ;;  %v884_v35 = vadd.f32 %v706_v5, %v699_v7  ;;  %v749_v39 = vrot.slane %v2703_v24, 4 }
  0x1d   : > { %v723_v25 = vrot.slane %v722_v18, 2  ;;  %v709_v26 = vrot.slane %v708_v19, 2  ;;  %v702_v27 = vrot.slane %v701_v20, 2  ;;  %v729_v28 = vadd.f32 %v728_v21, %v2694_v15 }
  0x1e   : > { %v2547_v29 = vpop.eup %2546  ;;  %v716_v30 = vrot.slane %v715_v22, 2  ;;  %v736_v31 = vadd.f32 %v735_v23, %v2697_v17  ;;  %v750_v56 = vadd.f32 %v749_v39, %v2703_v24  ;;  %v2712_v59 = vsel %vm403_vm0, %v327_v47, 0.0  ;;  %v336_v23 = vld [vmem:[%s2671_s24 + $0xe8] sm:$0xff] }
  0x1f   : > { %v517_v32 = vmul.f32 8.0, %v2547_v29  ;;  %v724_v33 = vadd.f32 %v723_v25, %v722_v18  ;;  %v710_v34 = vadd.f32 %v709_v26, %v708_v19  ;;  %v703_v36 = vadd.f32 %v702_v27, %v701_v20 }
  0x20   : > { %v730_v37 = vrot.slane %v729_v28, 2  ;;  %v717_v38 = vadd.f32 %v716_v30, %v715_v22  ;;  %v737_v43 = vrot.slane %v736_v31, 2  ;;  %vm521_vm1 = vweird.f32 %v2547_v29 }
  0x21   : > { %v518_v40 = vsub.f32 1.0, %v517_v32  ;;  %v725_v41 = vrot.slane %v724_v33, 1  ;;  %v711_v42 = vrot.slane %v710_v34, 1  ;;  %v704_v44 = vrot.slane %v703_v36, 1 }
  0x22   : > { %v731_v45 = vadd.f32 %v730_v37, %v729_v28  ;;  %v718_v46 = vrot.slane %v717_v38, 1  ;;  %v738_v52 = vadd.f32 %v737_v43, %v736_v31  ;;  %v2715_v60 = vsel %vm403_vm0, %v333_v48, 0.0 }
  0x23   : > { %v519_v49 = vmul.f32 %v2547_v29, %v518_v40  ;;  %v726_v50 = vadd.f32 %v725_v41, %v724_v33  ;;  %v712_v51 = vadd.f32 %v711_v42, %v710_v34  ;;  %v705_v53 = vadd.f32 %v704_v44, %v703_v36 }
  0x24   : > { %v732_v54 = vrot.slane %v731_v45, 1  ;;  %v719_v55 = vadd.f32 %v718_v46, %v717_v38  ;;  %v739_v58 = vrot.slane %v738_v52, 1  ;;  %v751_v62 = vrot.slane %v750_v56, 2  ;;  %v348_v38 = vld [vmem:[%s2671_s24 + $0x148] sm:$0xff] }
  0x25   : > { %v520_v57 = vadd.f32 %v2547_v29, %v519_v49  ;;  %v742_v63 = vrot.slane %v2712_v59, 4  ;;  %v885_v1 = vadd.f32 %v884_v35, %v713_v13  ;;  %v756_v3 = vrot.slane %v2715_v60, 4 }
  0x26   : > { %v733_v61 = vadd.f32 %v732_v54, %v731_v45  ;;  %v740_v2 = vadd.f32 %v739_v58, %v738_v52  ;;  %v752_v12 = vadd.f32 %v751_v62, %v750_v56  ;;  %v2731_v22 = vsel %vm403_vm0, %v339_v9, 0.0 }
  0x27   : > { %v2719_v0 = vsel %vm521_vm1, %v2547_v29, %v520_v57  ;;  %v743_v13 = vadd.f32 %v742_v63, %v2712_v59  ;;  %v342_v29 = vld [vmem:[%s2671_s24 + $0x118] sm:$0xff]  ;;  %v2736_v30 = vadd.f32 %v885_v1, %v2683_v4  ;;  %v757_v35 = vadd.f32 %v756_v3, %v2715_v60 }
  0x28   : > { %v814_v5 = vmul.f32 %v726_v50, %v2719_v0  ;;  %v812_v6 = vmul.f32 %v712_v51, %v2719_v0  ;;  %v811_v7 = vmul.f32 %v705_v53, %v2719_v0  ;;  %v815_v8 = vmul.f32 %v733_v61, %v2719_v0  ;;  %v345_v50 = vld [vmem:[%s2671_s24 + $0x130] sm:$0xff]  ;;  %v351_v61 = vld [vmem:[%s2671_s24 + $0x160] sm:$0xff] }
  0x29   : > { %v813_v10 = vmul.f32 %v719_v55, %v2719_v0  ;;  %v816_v11 = vmul.f32 %v740_v2, %v2719_v0  ;;  %v753_v20 = vrot.slane %v752_v12, 1  ;;  %v744_v21 = vrot.slane %v743_v13, 2 }
  0x2a   : > { %v830_v14 = vpack.c.bf16 %v814_v5, %v814_v5  ;;  %v828_v16 = vpack.c.bf16 %v812_v6, %v812_v6  ;;  %v827_v18 = vpack.c.bf16 %v811_v7, %v811_v7  ;;  %v831_v19 = vpack.c.bf16 %v815_v8, %v815_v8 }
  0x2b   : > { %v829_v28 = vpack.c.bf16 %v813_v10, %v813_v10  ;;  %v832_v31 = vpack.c.bf16 %v816_v11, %v816_v11  ;;  %v754_v32 = vadd.f32 %v753_v20, %v752_v12  ;;  %v745_v33 = vadd.f32 %v744_v21, %v743_v13  ;;  %v354_v12 = vld [vmem:[%s2671_s24 + $0x178] sm:$0xff] }
  0x2c   : > { %v925_v25 = vperm.slane %v830_v14, 0  ;;  %v923_v26 = vperm.slane %v828_v16, 0  ;;  %v922_v27 = vperm.slane %v827_v18, 0  ;;  %v926_v34 = vperm.slane %v831_v19, 0 }
  0x2d   : > { %v770_v36 = vrot.slane %v2731_v22, 4  ;;  %v2743_v37 = vsel %vm403_vm0, %v336_v23, 0.0  ;;  %v818_v4 = vmul.f32 %v754_v32, %v2719_v0  ;;  %v746_v39 = vrot.slane %v745_v33, 1 }
  0x2e   : > { %944 = vrot.lane.b32.xlu2 %v925_v25, %s2608_s4  ;;  %940 = vrot.lane.b32.xlu1 %v923_v26, %s2608_s4  ;;  %v763_v40 = vrot.slane %v2743_v37, 4  ;;  %v2750_v41 = vsel %vm403_vm0, %v342_v29, 0.0  ;;  %v924_v42 = vperm.slane %v829_v28, 0  ;;  %v758_v43 = vrot.slane %v757_v35, 2 }
  0x2f   : > { %938 = vrot.lane.b32.xlu0 %v922_v27, %s2608_s4  ;;  %v771_v44 = vadd.f32 %v770_v36, %v2731_v22  ;;  %v777_v45 = vrot.slane %v2750_v41, 4  ;;  %v834_v46 = vpack.c.bf16 %v818_v4, %v818_v4  ;;  %v747_v47 = vadd.f32 %v746_v39, %v745_v33 }
  0x30   : > { %v764_v48 = vadd.f32 %v763_v40, %v2743_v37  ;;  %v2756_v49 = vsel %vm403_vm0, %v348_v38, 0.0  ;;  %v927_v51 = vperm.slane %v832_v31, 0  ;;  %v759_v52 = vadd.f32 %v758_v43, %v757_v35 }
  0x31   : > { %v772_v53 = vrot.slane %v771_v44, 2  ;;  %v778_v54 = vadd.f32 %v777_v45, %v2750_v41  ;;  %v929_v55 = vperm.slane %v834_v46, 0  ;;  %v817_v56 = vmul.f32 %v747_v47, %v2719_v0 }
  0x32   : > { %v765_v57 = vrot.slane %v764_v48, 2  ;;  %v791_v58 = vrot.slane %v2756_v49, 4  ;;  %v760_v62 = vrot.slane %v759_v52, 1  ;;  %v2764_v2 = vsel %vm403_vm0, %v345_v50, 0.0 }
  0x33   : > { %v773_v63 = vadd.f32 %v772_v53, %v771_v44  ;;  %v779_v1 = vrot.slane %v778_v54, 2  ;;  %v833_v3 = vpack.c.bf16 %v817_v56, %v817_v56  ;;  %v784_v7 = vrot.slane %v2764_v2, 4 }
  0x34   : > { %v766_v5 = vadd.f32 %v765_v57, %v764_v48  ;;  %v792_v6 = vadd.f32 %v791_v58, %v2756_v49  ;;  %v761_v8 = vadd.f32 %v760_v62, %v759_v52  ;;  %v2771_v11 = vsel %vm403_vm0, %v351_v61, 0.0 }
  0x35   : > { %v774_v9 = vrot.slane %v773_v63, 1  ;;  %v780_v10 = vadd.f32 %v779_v1, %v778_v54  ;;  %v928_v13 = vperm.slane %v833_v3, 0  ;;  %v785_v18 = vadd.f32 %v784_v7, %v2764_v2  ;;  %v2803_v7 = vld [vmem:[%s2671_s24 + $0x20] sm:$0xff] }
  0x36   : > { %946 = vrot.lane.b32.xlu2 %v926_v34, %s2608_s4  ;;  %942 = vrot.lane.b32.xlu1 %v924_v42, %s2608_s4  ;;  %v767_v14 = vrot.slane %v766_v5, 1  ;;  %v793_v16 = vrot.slane %v792_v6, 2  ;;  %v819_v19 = vmul.f32 %v761_v8, %v2719_v0  ;;  %v798_v23 = vrot.slane %v2771_v11, 4 }
  0x37   : > { %948 = vrot.lane.b32.xlu0 %v927_v51, %s2608_s4  ;;  %v775_v20 = vadd.f32 %v774_v9, %v773_v63  ;;  %v781_v21 = vrot.slane %v780_v10, 1  ;;  %v786_v27 = vrot.slane %v785_v18, 2  ;;  %v2779_v28 = vsel %vm403_vm0, %v354_v12, 0.0  ;;  %v2808_v9 = vld [vmem:[%s2671_s24 + $0x38] sm:$0xff] }
  0x38   : > { %v768_v25 = vadd.f32 %v767_v14, %v766_v5  ;;  %v794_v26 = vadd.f32 %v793_v16, %v792_v6  ;;  %v835_v29 = vpack.c.bf16 %v819_v19, %v819_v19  ;;  %v799_v33 = vadd.f32 %v798_v23, %v2771_v11  ;;  %v2800_v6 = vld [vmem:[%s2671_s24 + $0x8] sm:$0xff] }
  0x39   : > { %v821_v31 = vmul.f32 %v775_v20, %v2719_v0  ;;  %v782_v32 = vadd.f32 %v781_v21, %v780_v10  ;;  %v787_v36 = vadd.f32 %v786_v27, %v785_v18  ;;  %v805_v38 = vrot.slane %v2779_v28, 4  ;;  %4258 = vst [vmem:[#allocation3_spill] sm:$0xff] %v2800_v6  ;;  %v2820_v18 = vld [vmem:[%s2671_s24 + $0x50] sm:$0xff]  ;;  %v2828_v21 = vld [vmem:[%s2671_s24 + $0x68] sm:$0xff] }
  0x3a   : > { %v820_v34 = vmul.f32 %v768_v25, %v2719_v0  ;;  %v795_v35 = vrot.slane %v794_v26, 1  ;;  %v887_v4 = vadd.f32 %v2736_v30, %v2694_v15  ;;  %v930_v39 = vperm.slane %v835_v29, 0  ;;  %v2833_v25 = vld [vmem:[%s2671_s24 + $0x80] sm:$0xff] }
  0x3b   : > { %v822_v40 = vmul.f32 %v782_v32, %v2719_v0  ;;  %v800_v42 = vrot.slane %v799_v33, 2  ;;  %v837_v43 = vpack.c.bf16 %v821_v31, %v821_v31  ;;  %v788_v44 = vrot.slane %v787_v36, 1  ;;  %v2843_v31 = vld [vmem:[%s2671_s24] sm:$0xff]  ;;  %v2846_v32 = vld [vmem:[%s2671_s24 + $0x18] sm:$0xff] }
  0x3c   : > { %v806_v45 = vadd.f32 %v805_v38, %v2779_v28  ;;  %v836_v46 = vpack.c.bf16 %v820_v34, %v820_v34  ;;  %v796_v47 = vadd.f32 %v795_v35, %v794_v26  ;;  %v888_v30 = vadd.f32 %v887_v4, %v2697_v17  ;;  %4259 = vst [vmem:[#allocation4_spill] sm:$0xff] %v2843_v31  ;;  %v2855_v35 = vld [vmem:[%s2671_s24 + $0x98] sm:$0xff] }
  0x3d   : > { %v801_v48 = vadd.f32 %v800_v42, %v799_v33  ;;  %v838_v50 = vpack.c.bf16 %v822_v40, %v822_v40  ;;  %v789_v51 = vadd.f32 %v788_v44, %v787_v36  ;;  %v932_v53 = vperm.slane %v837_v43, 0  ;;  %4260 = vst [vmem:[#allocation5_spill] sm:$0xff] %v2846_v32  ;;  %v2869_v42 = vld [vmem:[%s2671_s24 + $0xb0] sm:$0xff] }
  0x3e   : > { %952 = vrot.lane.b32.xlu2 %v929_v55, %s2608_s4  ;;  %950 = vrot.lane.b32.xlu1 %v928_v13, %s2608_s4  ;;  %v807_v15 = vrot.slane %v806_v45, 2  ;;  %v931_v56 = vperm.slane %v836_v46, 0  ;;  %v824_v55 = vmul.f32 %v796_v47, %v2719_v0  ;;  %v889_v63 = vadd.f32 %v888_v30, %v2712_v59  ;;  %v2873_v43 = vld [vmem:[%s2671_s24 + $0x30] sm:$0xff]  ;;  %v2882_v46 = vld [vmem:[%s2671_s24 + $0xc8] sm:$0xff] }
  0x3f   : > { %954 = vrot.lane.b32.xlu0 %v930_v39, %s2608_s4  ;;  %v802_v52 = vrot.slane %v801_v48, 1  ;;  %v823_v57 = vmul.f32 %v789_v51, %v2719_v0  ;;  %v933_v61 = vperm.slane %v838_v50, 0  ;;  %v2812_v10 = vsel %vm403_vm0, %v2800_v6, 0.0  ;;  %4261 = vst [vmem:[#allocation6_spill] sm:$0xff] %v2873_v43 }
  0x40   : > { %v808_v54 = vadd.f32 %v807_v15, %v806_v45  ;;  %v840_v17 = vpack.c.bf16 %v824_v55, %v824_v55  ;;  %v890_v59 = vadd.f32 %v889_v63, %v2703_v24  ;;  %v2816_v12 = vsel %vm403_vm0, %v2803_v7, 0.0 }
  0x41   : > { %v803_v58 = vadd.f32 %v802_v52, %v801_v48  ;;  %v839_v3 = vpack.c.bf16 %v823_v57, %v823_v57  ;;  %v2824_v24 = vsel %vm403_vm0, %v2808_v9, 0.0  ;;  %v867_v23 = vadd.f32 %v2816_v12, %v2812_v10  ;;  %v2886_v48 = vld [vmem:[%s2671_s24 + $0x48] sm:$0xff]  ;;  %v2898_v52 = vld [vmem:[%s2671_s24 + $0xe0] sm:$0xff]  ;;  %v2912_v57 = vld [vmem:[%s2671_s24 + $0xf8] sm:$0xff] }
  0x42   : > { %v809_v62 = vrot.slane %v808_v54, 1  ;;  %v935_v13 = vperm.slane %v840_v17, 0  ;;  %v891_v20 = vadd.f32 %v890_v59, %v2715_v60  ;;  %v2837_v26 = vsel %vm403_vm0, %v2820_v18, 0.0  ;;  %4262 = vst [vmem:[#allocation7_spill] sm:$0xff] %v2886_v48  ;;  %v2923_v17 = vld [vmem:[%s2671_s24 + $0x128] sm:$0xff] }
  0x43   : > { %v825_v1 = vmul.f32 %v803_v58, %v2719_v0  ;;  %v934_v14 = vperm.slane %v839_v3, 0  ;;  %v2609_v29 = vmov 16.0   ;;  %v868_v60 = vadd.f32 %v867_v23, %v2824_v24  ;;  %4263 = vst [vmem:[#allocation8_spill] sm:$0xff] %v2898_v52 }
  0x44   : > { %v810_v5 = vadd.f32 %v809_v62, %v808_v54  ;;  %2548 = vrcp.f32 %v2609_v29  ;;  %v2851_v33 = vsel %vm403_vm0, %v2828_v21, 0.0  ;;  %v892_v34 = vadd.f32 %v891_v20, %v2743_v37  ;;  %v2902_v54 = vld [vmem:[%s2671_s24 + $0x60] sm:$0xff]  ;;  %4265 = vst [vmem:[#allocation10_spill] sm:$0xff] %v2912_v57 }
  0x45   : > { %v841_v8 = vpack.c.bf16 %v825_v1, %v825_v1  ;;  %v869_v36 = vadd.f32 %v868_v60, %v2837_v26  ;;  %v2860_v38 = vsel %vm403_vm0, %v2833_v25, 0.0  ;;  %v404_v4 = vsel %vm403_vm0, %v2843_v31, 0.0  ;;  %4264 = vst [vmem:[#allocation9_spill] sm:$0xff] %v2902_v54  ;;  %v2920_v1 = vld [vmem:[%s2671_s24 + $0x110] sm:$0xff] }
  0x46   : > { %958 = vrot.lane.b32.xlu2 %v932_v53, %s2608_s4  ;;  %956 = vrot.lane.b32.xlu1 %v931_v56, %s2608_s4  ;;  %v826_v16 = vmul.f32 %v810_v5, %v2719_v0  ;;  %v2866_v39 = vsel %vm403_vm0, %v2846_v32, 0.0  ;;  %v2877_v44 = vsel %vm403_vm0, %v2855_v35, 0.0  ;;  %v893_v51 = vadd.f32 %v892_v34, %v2731_v22  ;;  %4267 = vst [vmem:[#allocation12_spill] sm:$0xff] %v2920_v1  ;;  %v2959_v34 = vld [vmem:[%s2671_s24 + $0xa8] sm:$0xff] }
  0x47   : > { %960 = vrot.lane.b32.xlu0 %v933_v61, %s2608_s4  ;;  %v936_v19 = vperm.slane %v841_v8, 0  ;;  %v870_v37 = vadd.f32 %v869_v36, %v2851_v33  ;;  %v843_v50 = vadd.f32 %v2866_v39, %v404_v4  ;;  %v2892_v15 = vsel %vm403_vm0, %v2869_v42, 0.0  ;;  %v2916_v61 = vld [vmem:[%s2671_s24 + $0x78] sm:$0xff]  ;;  %4268 = vst [vmem:[#allocation13_spill] sm:$0xff] %v2923_v17 }
  0x48   : > { %v842_v27 = vpack.c.bf16 %v826_v16, %v826_v16  ;;  %v418_v30 = vsel %vm403_vm0, %v2873_v43, 0.0  ;;  %v2906_v22 = vsel %vm403_vm0, %v2882_v46, 0.0  ;;  %v425_v55 = vsel %vm403_vm0, %v2886_v48, 0.0  ;;  %4266 = vst [vmem:[#allocation11_spill] sm:$0xff] %v2916_v61  ;;  %v2939_v16 = vld [vmem:[%s2671_s24 + $0x140] sm:$0xff] }
  0x49   : > { %v871_v47 = vadd.f32 %v870_v37, %v2860_v38  ;;  %v844_v62 = vadd.f32 %v843_v50, %v418_v30  ;;  %v894_v63 = vadd.f32 %v893_v51, %v2750_v41  ;;  %v2927_v3 = vsel %vm403_vm0, %v2898_v52, 0.0  ;;  %4270 = vst [vmem:[#allocation15_spill] sm:$0xff] %v2939_v16  ;;  %v3024_v48 = vld [vmem:[%s2671_s24 + $0x120] sm:$0xff] }
  0x4a   : > { %v937_v40 = vperm.slane %v842_v27, 0  ;;  %v2879_v45 = vpop.eup %2548  ;;  %v2931_v5 = vsel %vm403_vm0, %v2902_v54, 0.0  ;;  %v405_v8 = vrot.slane %v404_v4, 4  ;;  %v2947_v23 = vsel %vm403_vm0, %v2916_v61, 0.0  ;;  %4271 = vst [vmem:[#allocation16_spill] sm:$0xff] %v2959_v34  ;;  %v3008_v54 = vld [vmem:[%s2671_s24 + $0xf0] sm:$0xff] }
  0x4b   : > { %v872_v53 = vadd.f32 %v871_v47, %v2877_v44  ;;  %v859_v56 = vmul.f32 16.0, %v2879_v45  ;;  %v845_v41 = vadd.f32 %v844_v62, %v425_v55  ;;  %v2951_v29 = vsel %vm403_vm0, %v2920_v1, 0.0  ;;  %4276 = vst [vmem:[#allocation21_spill] sm:$0xff] %v3008_v54 }
  0x4c   : > { %v406_v27 = vadd.f32 %v405_v8, %v404_v4  ;;  %v419_v50 = vrot.slane %v418_v30, 4  ;;  %v2972_v51 = vsel %vm403_vm0, %v2939_v16, 0.0  ;;  %v426_v62 = vrot.slane %v425_v55, 4  ;;  %4278 = vst [vmem:[#allocation23_spill] sm:$0xff] %v3024_v48 }
  0x4d   : > { %v873_v58 = vadd.f32 %v872_v53, %v2892_v15  ;;  %v860_v20 = vsub.f32 1.0, %v859_v56  ;;  %v846_v36 = vadd.f32 %v845_v41, %v2931_v5  ;;  %v2976_v56 = vld [vmem:[%s2671_s24 + $0xc0] sm:$0xff]  ;;  %vm863_vm2 = vweird.f32 %v2879_v45 }
  0x4e   : > { %964 = vrot.lane.b32.xlu2 %v935_v13, %s2608_s4  ;;  %962 = vrot.lane.b32.xlu1 %v934_v14, %s2608_s4  ;;  %v2935_v13 = vld [vmem:[%s2671_s24 + $0x90] sm:$0xff]  ;;  %v895_v14 = vadd.f32 %v894_v63, %v2764_v2  ;;  %v2955_v2 = vsel %vm403_vm0, %v2923_v17, 0.0  ;;  %v407_v47 = vrot.slane %v406_v27, 2  ;;  %4273 = vst [vmem:[#allocation18_spill] sm:$0xff] %v2976_v56  ;;  %vm201_vm3 = vcmask 93184  }
  0x4f   : > { %966 = vrot.lane.b32.xlu0 %v936_v19, %s2608_s4  ;;  %v874_v59 = vadd.f32 %v873_v58, %v2906_v22  ;;  %4269 = vst [vmem:[#allocation14_spill] sm:$0xff] %v2935_v13  ;;  %v2943_v19 = vsel %vm403_vm0, %v2912_v57, 0.0  ;;  %v2967_v4 = vsel %vm403_vm0, %v2935_v13, 0.0  ;;  %v847_v58 = vadd.f32 %v846_v36, %v2947_v23  ;;  %v2980_v63 = vld [vmem:[%s2671_s24 + $0x170] sm:$0xff]  ;;  %v2994_v36 = vld [vmem:[%s2671_s24 + $0xd8] sm:$0xff] }
  0x50   : > { %v896_v37 = vadd.f32 %v895_v14, %v2756_v49  ;;  %4274 = vst [vmem:[#allocation19_spill] sm:$0xff] %v2980_v63  ;;  %v861_v8 = vmul.f32 %v2879_v45, %v860_v20  ;;  %v2985_v49 = vsel %vm403_vm0, %v2959_v34, 0.0  ;;  %v408_v41 = vadd.f32 %v407_v47, %v406_v27 }
  0x51   : > { %v875_v60 = vadd.f32 %v874_v59, %v2927_v3  ;;  %v412_v59 = vrot.slane %v2866_v39, 4  ;;  %4275 = vst [vmem:[#allocation20_spill] sm:$0xff] %v2994_v36  ;;  %v848_v31 = vadd.f32 %v847_v58, %v2967_v4  ;;  %v427_v13 = vadd.f32 %v426_v62, %v425_v55 }
  0x52   : > { %v2999_v20 = vsel %vm403_vm0, %v2976_v56, 0.0  ;;  %v897_v34 = vadd.f32 %v896_v37, %v2771_v11  ;;  %v409_v61 = vrot.slane %v408_v41, 1  ;;  %v420_v27 = vadd.f32 %v419_v50, %v418_v30  ;;  %v3013_v56 = vld [vmem:[%s2671_s24 + $0x108] sm:$0xff] }
  0x53   : > { %v876_v53 = vadd.f32 %v875_v60, %v2943_v19  ;;  %v3004_v47 = vsel %vm403_vm0, %v2980_v63, 0.0  ;;  %v849_v58 = vadd.f32 %v848_v31, %v2985_v49  ;;  %v428_v55 = vrot.slane %v427_v13, 2  ;;  %4277 = vst [vmem:[#allocation22_spill] sm:$0xff] %v3013_v56  ;;  %v3057_v63 = vld [vmem:[%s2671_s24 + $0x168] sm:$0xff] }
  0x54   : > { %v862_v62 = vadd.f32 %v2879_v45, %v861_v8  ;;  %v3017_v11 = vsel %vm403_vm0, %v2994_v36, 0.0  ;;  %v413_v30 = vadd.f32 %v412_v59, %v2866_v39  ;;  %v410_v37 = vadd.f32 %v409_v61, %v408_v41  ;;  %v3034_v59 = vld [vmem:[%s2671_s24 + $0x138] sm:$0xff]  ;;  %4281 = vst [vmem:[#allocation26_spill] sm:$0xff] %v3057_v63 }
  0x55   : > { %v877_v60 = vadd.f32 %v876_v53, %v2951_v29  ;;  %v429_v31 = vadd.f32 %v428_v55, %v427_v13  ;;  %v3028_v8 = vsel %vm403_vm0, %v3008_v54, 0.0  ;;  %v898_v36 = vadd.f32 %v897_v34, %v2779_v28  ;;  %4279 = vst [vmem:[#allocation24_spill] sm:$0xff] %v3034_v59 }
  0x56   : > { %968 = vrot.lane.b32.xlu1 %v937_v40, %s2608_s4  ;;  %v2963_v40 = vld [vmem:[%s2671_s24 + $0x158] sm:$0xff]  ;;  %v523_v43 = vmul.f32 %v2719_v0, %v410_v37  ;;  %v421_v39 = vrot.slane %v420_v27, 2  ;;  %v3038_v41 = vsel %vm403_vm0, %v3013_v56, 0.0  ;;  %v414_v55 = vrot.slane %v413_v30, 2  ;;  %v3045_v37 = vld [vmem:[%s2671_s24 + $0x150] sm:$0xff] }
  0x57   : > { %4272 = vst [vmem:[#allocation17_spill] sm:$0xff] %v2963_v40  ;;  %v2990_v14 = vsel %vm403_vm0, %v2963_v40, 0.0  ;;  %v878_v53 = vadd.f32 %v877_v60, %v2955_v2  ;;  %v850_v60 = vadd.f32 %v849_v58, %v2999_v20  ;;  %v864_v58 = vsel %vm863_vm2, %v2879_v45, %v862_v62 }
  0x58   : > { %v539_v54 = vpack.c.bf16 %v523_v43, %v523_v43  ;;  %v433_v28 = vrot.slane %v2931_v5, 4  ;;  %4280 = vst [vmem:[#allocation25_spill] sm:$0xff] %v3045_v37  ;;  %v899_v45 = vmul.f32 %v898_v36, %v864_v58  ;;  %v422_v43 = vadd.f32 %v421_v39, %v420_v27 }
  0x59   : > { %v879_v50 = vadd.f32 %v878_v53, %v2972_v51  ;;  %v851_v13 = vadd.f32 %v850_v60, %v3017_v11  ;;  %v430_v53 = vrot.slane %v429_v31, 1  ;;  %v3054_v60 = vsel %vm403_vm0, %v3034_v59, 0.0 }
  0x5a   : > { %v1112_v62 = vperm.slane %v539_v54, 0  ;;  %v434_v54 = vadd.f32 %v433_v28, %v2931_v5  ;;  %v447_v36 = vrot.slane %v2967_v4, 4  ;;  %v900_v28 = vpack.c.bf16 %v899_v45, %v899_v45 }
  0x5b   : > { %v880_v61 = vadd.f32 %v879_v50, %v2990_v14  ;;  %v3049_v50 = vsel %vm403_vm0, %v3024_v48, 0.0  ;;  %v852_v56 = vadd.f32 %v851_v13, %v3028_v8  ;;  %v431_v32 = vadd.f32 %v430_v53, %v429_v31 }
  0x5c   : > { %v440_v48 = vrot.slane %v2947_v23, 4  ;;  %v3064_v13 = vsel %vm403_vm0, %v3045_v37, 0.0  ;;  %v415_v31 = vadd.f32 %v414_v55, %v413_v30  ;;  %v3073_v53 = vsel %vm403_vm0, %v3057_v63, 0.0 }
  0x5d   : > { %v881_v34 = vadd.f32 %v880_v61, %v3004_v47  ;;  %v853_v61 = vadd.f32 %v852_v56, %v3038_v41  ;;  %v526_v40 = vmul.f32 %v2719_v0, %v431_v32  ;;  %v448_v30 = vadd.f32 %v447_v36, %v2967_v4 }
  0x5e   : > { %1128 = vrot.lane.b32.xlu1 %v1112_v62, %s2610_s5  ;;  %v441_v32 = vadd.f32 %v440_v48, %v2947_v23  ;;  %v461_v55 = vrot.slane %v2999_v20, 4  ;;  %v435_v59 = vrot.slane %v434_v54, 2  ;;  %v454_v23 = vrot.slane %v2985_v49, 4 }
  0x5f   : > { %v882_v6 = vmul.f32 %v881_v34, %v864_v58  ;;  %v854_v39 = vadd.f32 %v853_v61, %v3049_v50  ;;  %v542_v56 = vpack.c.bf16 %v526_v40, %v526_v40  ;;  %v423_v34 = vrot.slane %v422_v43, 1 }
  0x60   : > { %v442_v37 = vrot.slane %v441_v32, 2  ;;  %v449_v40 = vrot.slane %v448_v30, 2  ;;  %v468_v63 = vrot.slane %v3017_v11, 4  ;;  %v462_v36 = vadd.f32 %v461_v55, %v2999_v20 }
  0x61   : > { %v883_v27 = vpack.c.bf16 %v882_v6, %v882_v6  ;;  %v855_v5 = vadd.f32 %v854_v39, %v3054_v60  ;;  %v416_v6 = vrot.slane %v415_v31, 1  ;;  %v1115_v61 = vperm.slane %v542_v56, 0 }
  0x62   : > { %v424_v17 = vadd.f32 %v423_v34, %v422_v43  ;;  %v450_v4 = vadd.f32 %v449_v40, %v448_v30  ;;  %v443_v39 = vadd.f32 %v442_v37, %v441_v32  ;;  %v469_v56 = vadd.f32 %v468_v63, %v3017_v11 }
  0x63   : > { %v902_v62 = vunpack.c.l.b16 %v883_v27  ;;  %v856_v48 = vadd.f32 %v855_v5, %v3064_v13  ;;  %v1042_v27 = vunpack.c.l.b16 %v900_v28  ;;  %v436_v1 = vadd.f32 %v435_v59, %v434_v54 }
  0x64   : > { %v417_v57 = vadd.f32 %v416_v6, %v415_v31  ;;  %v455_v52 = vadd.f32 %v454_v23, %v2985_v49  ;;  %v470_v43 = vrot.slane %v469_v56, 2  ;;  %v525_v34 = vmul.f32 %v2719_v0, %v424_v17 }
  0x65   : > { %v903_v16 = vpack.c.b16 %v902_v62, %v902_v62  ;;  %v857_v45 = vadd.f32 %v856_v48, %v3073_v53  ;;  %v451_v62 = vrot.slane %v450_v4, 1  ;;  %v463_v30 = vrot.slane %v462_v36, 2 }
  0x66   : > { %1134 = vrot.lane.b32.xlu1 %v1115_v61, %s2610_s5  ;;  %v1043_v28 = vpack.c.b16 %v1042_v27, %v1042_v27  ;;  %v444_v37 = vrot.slane %v443_v39, 1  ;;  %v471_v32 = vadd.f32 %v470_v43, %v469_v56  ;;  %v437_v63 = vrot.slane %v436_v1, 1 }
  0x67   : > { %904 = vrot.lane.b32.xlu0 %v903_v16, %s2610_s5  ;;  %v865_v5 = vmul.f32 %v864_v58, %v857_v45  ;;  %v452_v20 = vadd.f32 %v451_v62, %v450_v4  ;;  %v482_v16 = vrot.slane %v3038_v41, 4  ;;  %v475_v59 = vrot.slane %v3028_v8, 4 }
  0x68   : > { %v524_v31 = vmul.f32 %v2719_v0, %v417_v57  ;;  %v456_v49 = vrot.slane %v455_v52, 2  ;;  %v472_v54 = vrot.slane %v471_v32, 1  ;;  %v541_v6 = vpack.c.bf16 %v525_v34, %v525_v34 }
  0x69   : > { %v866_v55 = vpack.c.bf16 %v865_v5, %v865_v5  ;;  %v529_v11 = vmul.f32 %v2719_v0, %v452_v20  ;;  %v464_v61 = vadd.f32 %v463_v30, %v462_v36  ;;  %v483_v40 = vadd.f32 %v482_v16, %v3038_v41 }
  0x6a   : > { %v445_v23 = vadd.f32 %v444_v37, %v443_v39  ;;  %v473_v4 = vadd.f32 %v472_v54, %v471_v32  ;;  %v510_v45 = vrot.slane %v3073_v53, 4  ;;  %v438_v27 = vadd.f32 %v437_v63, %v436_v1 }
  0x6b   : > { %v1037_v58 = vunpack.c.l.b16 %v866_v55  ;;  %v545_v17 = vpack.c.bf16 %v529_v11, %v529_v11  ;;  %v476_v62 = vadd.f32 %v475_v59, %v3028_v8  ;;  %v540_v57 = vpack.c.bf16 %v524_v31, %v524_v31 }
  0x6c   : > { %v457_v5 = vadd.f32 %v456_v49, %v455_v52  ;;  %v532_v43 = vmul.f32 %v2719_v0, %v473_v4  ;;  %v489_v36 = vrot.slane %v3049_v50, 4  ;;  %v1114_v41 = vperm.slane %v541_v6, 0 }
  0x6d   : > { %v1038_v48 = vpack.c.b16 %v1037_v58, %v1037_v58  ;;  %v1118_v56 = vperm.slane %v545_v17, 0  ;;  %v465_v34 = vrot.slane %v464_v61, 1  ;;  %v484_v39 = vrot.slane %v483_v40, 2 }
  0x6e   : > { %v528_v20 = vmul.f32 %v2719_v0, %v445_v23  ;;  %v548_v30 = vpack.c.bf16 %v532_v43, %v532_v43  ;;  %v490_v1 = vadd.f32 %v489_v36, %v3049_v50  ;;  %v503_v8 = vrot.slane %v3064_v13, 4 }
  0x6f   : > { %1044 = vrot.lane.b32.xlu0 %v1043_v28, %s2608_s4  ;;  %1039 = vrot.lane.b32.xlu2 %v1038_v48, %s2610_s5  ;;  %v527_v16 = vmul.f32 %v2719_v0, %v438_v27  ;;  %v477_v55 = vrot.slane %v476_v62, 2  ;;  %v511_v52 = vadd.f32 %v510_v45, %v3073_v53  ;;  %v1113_v28 = vperm.slane %v540_v57, 0 }
  0x70   : > { %1140 = vrot.lane.b32.xlu1 %v1118_v56, %s2610_s5  ;;  %v458_v37 = vrot.slane %v457_v5, 1  ;;  %v496_v32 = vrot.slane %v3054_v60, 4  ;;  %v491_v63 = vrot.slane %v490_v1, 2  ;;  %v466_v11 = vadd.f32 %v465_v34, %v464_v61 }
  0x71   : > { %v1121_v59 = vperm.slane %v548_v30, 0  ;;  %v485_v58 = vadd.f32 %v484_v39, %v483_v40  ;;  %v512_v31 = vrot.slane %v511_v52, 2  ;;  %v544_v49 = vpack.c.bf16 %v528_v20, %v528_v20 }
  0x72   : > { %v492_v50 = vadd.f32 %v491_v63, %v490_v1  ;;  %v504_v54 = vadd.f32 %v503_v8, %v3064_v13  ;;  %v543_v6 = vpack.c.bf16 %v527_v16, %v527_v16  ;;  %v478_v17 = vadd.f32 %v477_v55, %v476_v62 }
  0x73   : > { %v513_v48 = vadd.f32 %v512_v31, %v511_v52  ;;  %v459_v53 = vadd.f32 %v458_v37, %v457_v5  ;;  %v497_v23 = vadd.f32 %v496_v32, %v3054_v60  ;;  %v570_v61 = vrot.slane %v2824_v24, 4 }
  0x74   : > { %v493_v4 = vrot.slane %v492_v50, 1  ;;  %v531_v40 = vmul.f32 %v2719_v0, %v466_v11  ;;  %v486_v45 = vrot.slane %v485_v58, 1  ;;  %v563_v56 = vrot.slane %v2816_v12, 4 }
  0x75   : > { %v514_v27 = vrot.slane %v513_v48, 1  ;;  %v1117_v13 = vperm.slane %v544_v49, 0  ;;  %v505_v62 = vrot.slane %v504_v54, 2  ;;  %v571_v43 = vadd.f32 %v570_v61, %v2824_v24 }
  0x76   : > { %v494_v57 = vadd.f32 %v493_v4, %v492_v50  ;;  %v1116_v36 = vperm.slane %v543_v6, 0  ;;  %v479_v5 = vrot.slane %v478_v17, 1  ;;  %v556_v60 = vrot.slane %v2812_v10, 4 }
  0x77   : > { %1132 = vrot.lane.b32.xlu0 %v1114_v41, %s2610_s5  ;;  %1130 = vrot.lane.b32.xlu2 %v1113_v28, %s2610_s5  ;;  %v515_v41 = vadd.f32 %v514_v27, %v513_v48  ;;  %v530_v34 = vmul.f32 %v2719_v0, %v459_v53  ;;  %v498_v39 = vrot.slane %v497_v23, 2  ;;  %v572_v30 = vrot.slane %v571_v43, 2 }
  0x78   : > { %1146 = vrot.lane.b32.xlu1 %v1121_v59, %s2610_s5  ;;  %v535_v20 = vmul.f32 %v2719_v0, %v494_v57  ;;  %v547_v1 = vpack.c.bf16 %v531_v40, %v531_v40  ;;  %v487_v8 = vadd.f32 %v486_v45, %v485_v58  ;;  %v564_v16 = vadd.f32 %v563_v56, %v2816_v12 }
  0x79   : > { %v506_v52 = vadd.f32 %v505_v62, %v504_v54  ;;  %v538_v24 = vmul.f32 %v2719_v0, %v515_v41  ;;  %v573_v28 = vadd.f32 %v572_v30, %v571_v43  ;;  %v480_v37 = vadd.f32 %v479_v5, %v478_v17 }
  0x7a   : > { %v551_v55 = vpack.c.bf16 %v535_v20, %v535_v20  ;;  %v557_v32 = vadd.f32 %v556_v60, %v2812_v10  ;;  %v546_v63 = vpack.c.bf16 %v530_v34, %v530_v34  ;;  %v499_v11 = vadd.f32 %v498_v39, %v497_v23 }
  0x7b   : > { %v574_v31 = vrot.slane %v573_v28, 1  ;;  %v1120_v49 = vperm.slane %v547_v1, 0  ;;  %v534_v58 = vmul.f32 %v2719_v0, %v487_v8  ;;  %v565_v12 = vrot.slane %v564_v16, 2 }
  0x7c   : > { %v1124_v59 = vperm.slane %v551_v55, 0  ;;  %v507_v50 = vrot.slane %v506_v52, 1  ;;  %v554_v54 = vpack.c.bf16 %v538_v24, %v538_v24  ;;  %v584_v48 = vrot.slane %v2851_v33, 4 }
  0x7d   : > { %v575_v6 = vadd.f32 %v574_v31, %v573_v28  ;;  %v558_v17 = vrot.slane %v557_v32, 2  ;;  %v577_v10 = vrot.slane %v2837_v26, 4  ;;  %v591_v53 = vrot.slane %v2860_v38, 4 }
  0x7e   : > { %v1119_v4 = vperm.slane %v546_v63, 0  ;;  %v533_v23 = vmul.f32 %v2719_v0, %v480_v37  ;;  %v500_v61 = vrot.slane %v499_v11, 1  ;;  %v566_v40 = vadd.f32 %v565_v12, %v564_v16 }
  0x7f   : > { %1138 = vrot.lane.b32.xlu0 %v1117_v13, %s2610_s5  ;;  %1136 = vrot.lane.b32.xlu2 %v1116_v36, %s2610_s5  ;;  %v585_v45 = vadd.f32 %v584_v48, %v2851_v33  ;;  %v592_v27 = vadd.f32 %v591_v53, %v2860_v38  ;;  %v550_v56 = vpack.c.bf16 %v534_v58, %v534_v58  ;;  %v1127_v57 = vperm.slane %v554_v54, 0 }
  0x80   : > { %1152 = vrot.lane.b32.xlu1 %v1124_v59, %s2610_s5  ;;  %v508_v13 = vadd.f32 %v507_v50, %v506_v52  ;;  %v669_v62 = vmul.f32 %v575_v6, %v2719_v0  ;;  %v559_v43 = vadd.f32 %v558_v17, %v557_v32  ;;  %v578_v36 = vadd.f32 %v577_v10, %v2837_v26 }
  0x81   : > { %v593_v5 = vrot.slane %v592_v27, 2  ;;  %v549_v60 = vpack.c.bf16 %v533_v23, %v533_v23  ;;  %v501_v41 = vadd.f32 %v500_v61, %v499_v11  ;;  %v612_v34 = vrot.slane %v2906_v22, 4 }
  0x82   : > { %v567_v33 = vrot.slane %v566_v40, 1  ;;  %v586_v39 = vrot.slane %v585_v45, 2  ;;  %v605_v20 = vrot.slane %v2892_v15, 4  ;;  %v1123_v30 = vperm.slane %v550_v56, 0 }
  0x83   : > { %v594_v38 = vadd.f32 %v593_v5, %v592_v27  ;;  %v537_v1 = vmul.f32 %v2719_v0, %v508_v13  ;;  %v685_v8 = vpack.c.bf16 %v669_v62, %v669_v62  ;;  %v613_v26 = vadd.f32 %v612_v34, %v2906_v22 }
  0x84   : > { %v560_v16 = vrot.slane %v559_v43, 1  ;;  %v579_v55 = vrot.slane %v578_v36, 2  ;;  %v1122_v24 = vperm.slane %v549_v60, 0  ;;  %v536_v28 = vmul.f32 %v2719_v0, %v501_v41 }
  0x85   : > { %v595_v52 = vrot.slane %v594_v38, 1  ;;  %v598_v37 = vrot.slane %v2877_v44, 4  ;;  %v614_v32 = vrot.slane %v613_v26, 2  ;;  %v568_v63 = vadd.f32 %v567_v33, %v566_v40 }
  0x86   : > { %v587_v11 = vadd.f32 %v586_v39, %v585_v45  ;;  %v606_v31 = vadd.f32 %v605_v20, %v2892_v15  ;;  %v1178_v58 = vperm.slane %v685_v8, 0  ;;  %v561_v22 = vadd.f32 %v560_v16, %v559_v43 }
  0x87   : > { %1144 = vrot.lane.b32.xlu0 %v1120_v49, %s2610_s5  ;;  %1142 = vrot.lane.b32.xlu2 %v1119_v4, %s2610_s5  ;;  %v596_v59 = vadd.f32 %v595_v52, %v594_v38  ;;  %v553_v49 = vpack.c.bf16 %v537_v1, %v537_v1  ;;  %v615_v12 = vadd.f32 %v614_v32, %v613_v26  ;;  %v626_v40 = vrot.slane %v2943_v19, 4 }
  0x88   : > { %1158 = vrot.lane.b32.xlu1 %v1127_v57, %s2610_s5  ;;  %v580_v50 = vadd.f32 %v579_v55, %v578_v36  ;;  %v552_v6 = vpack.c.bf16 %v536_v28, %v536_v28  ;;  %v599_v48 = vadd.f32 %v598_v37, %v2877_v44  ;;  %v668_v10 = vmul.f32 %v568_v63, %v2719_v0  ;;  %v3159_v20 = vpop.permute.xlu2 %944 }
  0x89   : > { %v672_v54 = vmul.f32 %v596_v59, %v2719_v0  ;;  %v616_v17 = vrot.slane %v615_v12, 1  ;;  %v588_v53 = vrot.slane %v587_v11, 1  ;;  %v607_v4 = vrot.slane %v606_v31, 2 }
  0x8a   : > { %v1126_v15 = vperm.slane %v553_v49, 0  ;;  %v667_v45 = vmul.f32 %v561_v22, %v2719_v0  ;;  %v581_v27 = vrot.slane %v580_v50, 1  ;;  %v1125_v56 = vperm.slane %v552_v6, 0 }
  0x8b   : > { %v688_v23 = vpack.c.bf16 %v672_v54, %v672_v54  ;;  %v617_v61 = vadd.f32 %v616_v17, %v615_v12  ;;  %v600_v13 = vrot.slane %v599_v48, 2  ;;  %v619_v57 = vrot.slane %v2927_v3, 4 }
  0x8c   : > { %v633_v44 = vrot.slane %v2951_v29, 4  ;;  %v684_v62 = vpack.c.bf16 %v668_v10, %v668_v10  ;;  %v589_v43 = vadd.f32 %v588_v53, %v587_v11  ;;  %v608_v36 = vadd.f32 %v607_v4, %v606_v31 }
  0x8d   : > { %v1181_v5 = vperm.slane %v688_v23, 0  ;;  %v675_v60 = vmul.f32 %v617_v61, %v2719_v0  ;;  %v627_v41 = vadd.f32 %v626_v40, %v2943_v19  ;;  %v683_v33 = vpack.c.bf16 %v667_v45, %v667_v45 }
  0x8e   : > { %v634_v34 = vadd.f32 %v633_v44, %v2951_v29  ;;  %v582_v39 = vadd.f32 %v581_v27, %v580_v50  ;;  %v654_v38 = vrot.slane %v2990_v14, 4  ;;  %v620_v1 = vadd.f32 %v619_v57, %v2927_v3 }
  0x8f   : > { %1150 = vrot.lane.b32.xlu0 %v1123_v30, %s2610_s5  ;;  %1148 = vrot.lane.b32.xlu2 %v1122_v24, %s2610_s5  ;;  %v601_v30 = vadd.f32 %v600_v13, %v599_v48  ;;  %v1177_v26 = vperm.slane %v684_v62, 0  ;;  %v671_v16 = vmul.f32 %v589_v43, %v2719_v0  ;;  %v609_v55 = vrot.slane %v608_v36, 1 }
  0x90   : > { %1196 = vrot.lane.b32.xlu1 %v1178_v58, %s2608_s4  ;;  %v635_v8 = vrot.slane %v634_v34, 2  ;;  %v655_v19 = vadd.f32 %v654_v38, %v2990_v14  ;;  %v691_v29 = vpack.c.bf16 %v675_v60, %v675_v60  ;;  %v628_v52 = vrot.slane %v627_v41, 2  ;;  %v3174_v61 = vpop.permute.xlu2 %946 }
  0x91   : > { %v647_v28 = vrot.slane %v2972_v51, 4  ;;  %v1176_v37 = vperm.slane %v683_v33, 0  ;;  %v670_v32 = vmul.f32 %v582_v39, %v2719_v0  ;;  %v602_v11 = vrot.slane %v601_v30, 1 }
  0x92   : > { %v636_v24 = vadd.f32 %v635_v8, %v634_v34  ;;  %v656_v63 = vrot.slane %v655_v19, 2  ;;  %v621_v3 = vrot.slane %v620_v1, 2  ;;  %v640_v59 = vrot.slane %v2955_v2, 4 }
  0x93   : > { %v687_v49 = vpack.c.bf16 %v671_v16, %v671_v16  ;;  %v610_v58 = vadd.f32 %v609_v55, %v608_v36  ;;  %v1184_v14 = vperm.slane %v691_v29, 0  ;;  %v629_v22 = vadd.f32 %v628_v52, %v627_v41 }
  0x94   : > { %v637_v31 = vrot.slane %v636_v24, 1  ;;  %v657_v12 = vadd.f32 %v656_v63, %v655_v19  ;;  %v648_v54 = vadd.f32 %v647_v28, %v2972_v51  ;;  %v686_v6 = vpack.c.bf16 %v670_v32, %v670_v32 }
  0x95   : > { %v603_v17 = vadd.f32 %v602_v11, %v601_v30  ;;  %v622_v10 = vadd.f32 %v621_v3, %v620_v1  ;;  %v641_v53 = vadd.f32 %v640_v59, %v2955_v2  ;;  %v674_v23 = vmul.f32 %v610_v58, %v2719_v0 }
  0x96   : > { %v638_v50 = vadd.f32 %v637_v31, %v636_v24  ;;  %v658_v48 = vrot.slane %v657_v12, 1  ;;  %v630_v40 = vrot.slane %v629_v22, 1  ;;  %v649_v51 = vrot.slane %v648_v54, 2 }
  0x97   : > { %1156 = vrot.lane.b32.xlu0 %v1126_v15, %s2610_s5  ;;  %1154 = vrot.lane.b32.xlu2 %v1125_v56, %s2610_s5  ;;  %v1180_v15 = vperm.slane %v687_v49, 0  ;;  %v661_v56 = vrot.slane %v3004_v47, 4  ;;  %v1179_v13 = vperm.slane %v686_v6, 0  ;;  %v673_v57 = vmul.f32 %v603_v17, %v2719_v0 }
  0x98   : > { %1202 = vrot.lane.b32.xlu1 %v1181_v5, %s2608_s4  ;;  %v678_v4 = vmul.f32 %v638_v50, %v2719_v0  ;;  %v659_v27 = vadd.f32 %v658_v48, %v657_v12  ;;  %v623_v44 = vrot.slane %v622_v10, 1  ;;  %v642_v2 = vrot.slane %v641_v53, 2  ;;  %v3187_v55 = vpop.permute.xlu2 %952 }
  0x99   : > { %v690_v62 = vpack.c.bf16 %v674_v23, %v674_v23  ;;  %v631_v36 = vadd.f32 %v630_v40, %v629_v22  ;;  %v650_v60 = vadd.f32 %v649_v51, %v648_v54  ;;  %v689_v34 = vpack.c.bf16 %v673_v57, %v673_v57 }
  0x9a   : > { %v694_v45 = vpack.c.bf16 %v678_v4, %v678_v4  ;;  %v681_v41 = vmul.f32 %v659_v27, %v2719_v0  ;;  %v624_v33 = vadd.f32 %v623_v44, %v622_v10  ;;  %v643_v39 = vadd.f32 %v642_v2, %v641_v53 }
  0x9b   : > { %v662_v38 = vadd.f32 %v661_v56, %v3004_v47  ;;  %v1183_v30 = vperm.slane %v690_v62, 0  ;;  %v677_v1 = vmul.f32 %v631_v36, %v2719_v0  ;;  %v651_v8 = vrot.slane %v650_v60, 1 }
  0x9c   : > { %v1187_v5 = vperm.slane %v694_v45, 0  ;;  %v1182_v16 = vperm.slane %v689_v34, 0  ;;  %v676_v19 = vmul.f32 %v624_v33, %v2719_v0  ;;  %v644_v52 = vrot.slane %v643_v39, 1  ;;  %v4286_v34 = vld [vmem:[#allocation15_spill] sm:$0xff] }
  0x9d   : > { %v663_v24 = vrot.slane %v662_v38, 2  ;;  %v693_v28 = vpack.c.bf16 %v677_v1, %v677_v1  ;;  %v652_v47 = vadd.f32 %v651_v8, %v650_v60  ;;  %v2611_v51 = vmov 0   ;;  %v4284_v60 = vld [vmem:[#allocation12_spill] sm:$0xff]  ;;  %v4289_v1 = vld [vmem:[#allocation3_spill] sm:$0xff] }
  0x9e   : > { %v692_v32 = vpack.c.bf16 %v676_v19, %v676_v19  ;;  %v645_v63 = vadd.f32 %v644_v52, %v643_v39  ;;  %202 = vst.msk [vmem:[#allocation2] sm:$0xf] %vm201_vm3, %v2611_v51  ;;  %v372_v56 = vpack.c.bf16 %v2803_v7, %v2803_v7  ;;  %v374_v57 = vpack.c.bf16 %v2820_v18, %v2820_v18  ;;  %v4282_v18 = vld [vmem:[#allocation8_spill] sm:$0xff]  ;;  %v4287_v39 = vld [vmem:[#allocation17_spill] sm:$0xff]  ;;  %v4291_v19 = vld [vmem:[#allocation6_spill] sm:$0xff] }
  0x9f   : > { %1194 = vrot.lane.b32.xlu0 %v1177_v26, %s2608_s4  ;;  %1192 = vrot.lane.b32.xlu2 %v1176_v37, %s2608_s4  ;;  %v697_v26 = vpack.c.bf16 %v681_v41, %v681_v41  ;;  %v664_v3 = vadd.f32 %v663_v24, %v662_v38  ;;  %v1186_v59 = vperm.slane %v693_v28, 0  ;;  %v680_v31 = vmul.f32 %v652_v47, %v2719_v0  ;;  %v4288_v38 = vld [vmem:[#allocation19_spill] sm:$0xff]  ;;  %v4293_v47 = vld [vmem:[#allocation9_spill] sm:$0xff] }
  0xa0   : > { %1208 = vrot.lane.b32.xlu1 %v1184_v14, %s2608_s4  ;;  %v3190_v29 = vpop.permute.xlu1 %940  ;;  %v1185_v49 = vperm.slane %v692_v32, 0  ;;  %v679_v58 = vmul.f32 %v645_v63, %v2719_v0  ;;  %v3199_v14 = vpop.permute.xlu2 %958  ;;  %203 = vst.msk [vmem:[#allocation2 + $0x4] sm:$0xf] %vm201_vm3, %v2611_v51  ;;  %v375_v44 = vpack.c.bf16 %v2828_v21, %v2828_v21  ;;  %v376_v2 = vpack.c.bf16 %v2833_v25, %v2833_v25  ;;  %v4292_v24 = vld [vmem:[#allocation7_spill] sm:$0xff] }
  0xa1   : > { %v3180_v43 = vpop.permute.xlu0 %938  ;;  %v1190_v37 = vperm.slane %v697_v26, 0  ;;  %v665_v12 = vrot.slane %v664_v3, 1  ;;  %v696_v50 = vpack.c.bf16 %v680_v31, %v680_v31  ;;  %211 = vst.msk [vmem:[#allocation2 + $0x10] sm:$0xf] %vm201_vm3, %v2611_v51  ;;  %v377_v62 = vpack.c.bf16 %v2855_v35, %v2855_v35  ;;  %v4290_v26 = vld [vmem:[#allocation5_spill] sm:$0xff]  ;;  %v4294_v32 = vld [vmem:[#allocation11_spill] sm:$0xff] }
  0xa2   : > { %v695_v54 = vpack.c.bf16 %v679_v58, %v679_v58  ;;  %212 = vst.msk [vmem:[#allocation2 + $0x14] sm:$0xf] %vm201_vm3, %v2611_v51  ;;  %v378_v7 = vpack.c.bf16 %v2869_v42, %v2869_v42  ;;  %v380_v21 = vpack.c.bf16 %v4282_v18, %v4282_v18  ;;  %v382_v35 = vpack.c.bf16 %v4284_v60, %v4284_v60  ;;  %v4285_v42 = vld [vmem:[#allocation13_spill] sm:$0xff]  ;;  %v4296_v31 = vld [vmem:[#allocation16_spill] sm:$0xff] }
  0xa3   : > { %v666_v6 = vadd.f32 %v665_v12, %v664_v3  ;;  %v1189_v48 = vperm.slane %v696_v50, 0  ;;  %217 = vst.msk [vmem:[#allocation2 + $0x20] sm:$0xf] %vm201_vm3, %v2611_v51  ;;  %v383_v41 = vpack.c.bf16 %v4285_v42, %v4285_v42  ;;  %v384_v33 = vpack.c.bf16 %v4286_v34, %v4286_v34  ;;  %v4295_v3 = vld [vmem:[#allocation14_spill] sm:$0xff]  ;;  %v4303_v42 = vld [vmem:[#allocation25_spill] sm:$0xff] }
  0xa4   : > { %v1188_v10 = vperm.slane %v695_v54, 0  ;;  %218 = vst.msk [vmem:[#allocation2 + $0x24] sm:$0xf] %vm201_vm3, %v2611_v51  ;;  %v371_v8 = vpack.c.bf16 %v4289_v1, %v4289_v1  ;;  %v357_v52 = vpack.c.bf16 %v4291_v19, %v4291_v19  ;;  %v358_v28 = vpack.c.bf16 %v4292_v24, %v4292_v24  ;;  %v4297_v12 = vld [vmem:[#allocation18_spill] sm:$0xff]  ;;  %v4298_v54 = vld [vmem:[#allocation20_spill] sm:$0xff] }
  0xa5   : > { %v682_v53 = vmul.f32 %v666_v6, %v2719_v0  ;;  %223 = vst.msk [vmem:[#allocation2 + $0x30] sm:$0xf] %vm201_vm3, %v2611_v51  ;;  %v360_v63 = vpack.c.bf16 %v4294_v32, %v4294_v32  ;;  %v363_v50 = vpack.c.bf16 %v4297_v12, %v4297_v12  ;;  %v364_v6 = vpack.c.bf16 %v4298_v54, %v4298_v54 }
  0xa6   : > { %224 = vst.msk [vmem:[#allocation2 + $0x34] sm:$0xf] %vm201_vm3, %v2611_v51  ;;  %v369_v34 = vpack.c.bf16 %v4303_v42, %v4303_v42  ;;  %vm1003_vm4 = vcmask 64512   ;;  %vm1336_vm5 = vcmask 1043456   ;;  %vm205_vm6 = vcmask 90112  }
  0xa7   : > { %1200 = vrot.lane.b32.xlu0 %v1180_v15, %s2608_s4  ;;  %1198 = vrot.lane.b32.xlu2 %v1179_v13, %s2608_s4  ;;  %v698_v15 = vpack.c.bf16 %v682_v53, %v682_v53  ;;  %229 = vst.msk [vmem:[#allocation2 + $0x40] sm:$0xf] %vm201_vm3, %v2611_v51  ;;  %v373_v13 = vpack.c.bf16 %v2808_v9, %v2808_v9  ;;  %v4300_v53 = vld [vmem:[#allocation22_spill] sm:$0xff]  ;;  %vm206_vm7 = vsmask.f32 256 }
  0xa8   : > { %1214 = vrot.lane.b32.xlu1 %v1187_v5, %s2608_s4  ;;  %v3202_v22 = vpop.permute.xlu1 %942  ;;  %v3210_v4 = vpop.permute.xlu2 %964  ;;  %230 = vst.msk [vmem:[#allocation2 + $0x44] sm:$0xf] %vm201_vm3, %v2611_v51  ;;  %v379_v9 = vpack.c.bf16 %v2882_v46, %v2882_v46  ;;  %v4283_v5 = vld [vmem:[#allocation10_spill] sm:$0xff]  ;;  %v385_v46 = vpack.c.bf16 %v4287_v39, %v4287_v39  ;;  %vm3729_vm8 = vmand %vm205_vm6, %vm206_vm7 }
  0xa9   : > { %v3194_v11 = vpop.permute.xlu0 %948  ;;  %v1191_v40 = vperm.slane %v698_v15, 0  ;;  %235 = vst.msk [vmem:[#allocation2 + $0x50] sm:$0xf] %vm201_vm3, %v2611_v51  ;;  %v381_v25 = vpack.c.bf16 %v4283_v5, %v4283_v5  ;;  %v366_v15 = vpack.c.bf16 %v4300_v53, %v4300_v53  ;;  %v4302_v5 = vld [vmem:[#allocation24_spill] sm:$0xff]  ;;  %v4304_v39 = vld [vmem:[#allocation26_spill] sm:$0xff] }
  0xaa   : > { %236 = vst.msk [vmem:[#allocation2 + $0x54] sm:$0xf] %vm201_vm3, %v2611_v51  ;;  %v368_v60 = vpack.c.bf16 %v4302_v5, %v4302_v5 }
  0xab   : > { %241 = vst.msk [vmem:[#allocation2 + $0x60] sm:$0xf] %vm201_vm3, %v2611_v51 }
  0xac   : > { %242 = vst.msk [vmem:[#allocation2 + $0x64] sm:$0xf] %vm201_vm3, %v2611_v51 }
  0xad   : > { %247 = vst.msk [vmem:[#allocation2 + $0x70] sm:$0xf] %vm201_vm3, %v2611_v51 }
  0xae   : > { %248 = vst.msk [vmem:[#allocation2 + $0x74] sm:$0xf] %vm201_vm3, %v2611_v51 }
  0xaf   : > { %1206 = vrot.lane.b32.xlu0 %v1183_v30, %s2608_s4  ;;  %1204 = vrot.lane.b32.xlu2 %v1182_v16, %s2608_s4  ;;  %v386_v30 = vpack.c.bf16 %v4288_v38, %v4288_v38  ;;  %v356_v16 = vpack.c.bf16 %v4290_v26, %v4290_v26  ;;  %v370_v38 = vpack.c.bf16 %v4304_v39, %v4304_v39  ;;  %v4305_v26 = vld [vmem:[#allocation4_spill] sm:$0xff] }
  0xb0   : > { %1220 = vrot.lane.b32.xlu1 %v1190_v37, %s2608_s4  ;;  %v3212_v23 = vpop.permute.xlu1 %950  ;;  %v359_v37 = vpack.c.bf16 %v4293_v47, %v4293_v47  ;;  %253 = vst.msk [vmem:[#allocation2 + $0x80] sm:$0xf] %vm201_vm3, %v2611_v51  ;;  %v355_v19 = vpack.c.bf16 %v4305_v26, %v4305_v26 }
  0xb1   : > { %v3205_v17 = vpop.permute.xlu0 %954  ;;  %254 = vst.msk [vmem:[#allocation2 + $0x84] sm:$0xf] %vm201_vm3, %v2611_v51 }
  0xb2   : > { %259 = vst.msk [vmem:[#allocation2 + $0x90] sm:$0xf] %vm201_vm3, %v2611_v51 }
  0xb3   : > { %260 = vst.msk [vmem:[#allocation2 + $0x94] sm:$0xf] %vm201_vm3, %v2611_v51 }
  0xb4   : > { %265 = vst.msk [vmem:[#allocation2 + $0xa0] sm:$0xf] %vm201_vm3, %v2611_v51 }
  0xb5   : > { %266 = vst.msk [vmem:[#allocation2 + $0xa4] sm:$0xf] %vm201_vm3, %v2611_v51 }
  0xb6   : > { %271 = vst.msk [vmem:[#allocation2 + $0xb0] sm:$0xf] %vm201_vm3, %v2611_v51 }
  0xb7   : > { %1212 = vrot.lane.b32.xlu0 %v1186_v59, %s2608_s4  ;;  %1210 = vrot.lane.b32.xlu2 %v1185_v49, %s2608_s4  ;;  %v361_v59 = vpack.c.bf16 %v4295_v3, %v4295_v3  ;;  %v362_v49 = vpack.c.bf16 %v4296_v31, %v4296_v31  ;;  %272 = vst.msk [vmem:[#allocation2 + $0xb4] sm:$0xf] %vm201_vm3, %v2611_v51 }
  0xb8   : > { %v3231_v27 = vpop.permute.xlu1 %956  ;;  %277 = vst.msk [vmem:[#allocation2 + $0xc0] sm:$0xf] %vm201_vm3, %v2611_v51 }
  0xb9   : > { %v3214_v45 = vpop.permute.xlu0 %960  ;;  %278 = vst.msk [vmem:[#allocation2 + $0xc4] sm:$0xf] %vm201_vm3, %v2611_v51 }
  0xba   : > { %283 = vst.msk [vmem:[#allocation2 + $0xd0] sm:$0xf] %vm201_vm3, %v2611_v51 }
  0xbb   : > { %284 = vst.msk [vmem:[#allocation2 + $0xd4] sm:$0xf] %vm201_vm3, %v2611_v51 }
  0xbc   : > { %289 = vst.msk [vmem:[#allocation2 + $0xe0] sm:$0xf] %vm201_vm3, %v2611_v51 }
  0xbd   : > { %290 = vst.msk [vmem:[#allocation2 + $0xe4] sm:$0xf] %vm201_vm3, %v2611_v51 }
  0xbe   : > { %295 = vst.msk [vmem:[#allocation2 + $0xf0] sm:$0xf] %vm201_vm3, %v2611_v51 }
  0xbf   : > { %1218 = vrot.lane.b32.xlu0 %v1189_v48, %s2608_s4  ;;  %1216 = vrot.lane.b32.xlu2 %v1188_v10, %s2608_s4  ;;  %v4299_v48 = vld [vmem:[#allocation21_spill] sm:$0xff]  ;;  %296 = vst.msk [vmem:[#allocation2 + $0xf4] sm:$0xf] %vm201_vm3, %v2611_v51 }
  0xc0   : > { %v365_v10 = vpack.c.bf16 %v4299_v48, %v4299_v48  ;;  %v3319_v1 = vpop.permute.xlu1 %962  ;;  %204 = vst.msk [vmem:[#allocation2 + $0x8] sm:$0xf] %vm201_vm3, %v2611_v51 }
  0xc1   : > { %v3255_v36 = vpop.permute.xlu0 %966  ;;  %213 = vst.msk [vmem:[#allocation2 + $0x18] sm:$0xf] %vm201_vm3, %v2611_v51 }
  0xc2   : > { %219 = vst.msk [vmem:[#allocation2 + $0x28] sm:$0xf] %vm201_vm3, %v2611_v51 }
  0xc3   : > { %225 = vst.msk [vmem:[#allocation2 + $0x38] sm:$0xf] %vm201_vm3, %v2611_v51 }
  0xc4   : > { %231 = vst.msk [vmem:[#allocation2 + $0x48] sm:$0xf] %vm201_vm3, %v2611_v51 }
  0xc5   : > { %237 = vst.msk [vmem:[#allocation2 + $0x58] sm:$0xf] %vm201_vm3, %v2611_v51 }
  0xc6   : > { %243 = vst.msk [vmem:[#allocation2 + $0x68] sm:$0xf] %vm201_vm3, %v2611_v51 }
  0xc7   : > { %1222 = vrot.lane.b32.xlu2 %v1191_v40, %s2608_s4  ;;  %v4301_v40 = vld [vmem:[#allocation23_spill] sm:$0xff]  ;;  %249 = vst.msk [vmem:[#allocation2 + $0x78] sm:$0xf] %vm201_vm3, %v2611_v51 }
  0xc8   : > { %v367_v18 = vpack.c.bf16 %v4301_v40, %v4301_v40  ;;  %255 = vst.msk [vmem:[#allocation2 + $0x88] sm:$0xf] %vm201_vm3, %v2611_v51 }
  0xc9   : > { %v3229_v0 = vpop.permute.xlu2 %1039  ;;  %261 = vst.msk [vmem:[#allocation2 + $0x98] sm:$0xf] %vm201_vm3, %v2611_v51 }
  0xca   : > { %v3327_v24 = vsel %vm403_vm0, %v371_v8, %v3229_v0  ;;  %v3331_v47 = vsel %vm403_vm0, %v372_v56, %v3229_v0  ;;  %v3337_v32 = vsel %vm403_vm0, %v373_v13, %v3229_v0  ;;  %v3341_v3 = vsel %vm403_vm0, %v374_v57, %v3229_v0  ;;  %267 = vst.msk [vmem:[#allocation2 + $0xa8] sm:$0xf] %vm201_vm3, %v2611_v51 }
  0xcb   : > { %v3345_v8 = vsel %vm403_vm0, %v375_v44, %v3229_v0  ;;  %v3349_v56 = vsel %vm403_vm0, %v376_v2, %v3229_v0  ;;  %v3355_v31 = vsel %vm403_vm0, %v377_v62, %v3229_v0  ;;  %v3359_v13 = vsel %vm403_vm0, %v378_v7, %v3229_v0  ;;  %273 = vst.msk [vmem:[#allocation2 + $0xb8] sm:$0xf] %vm201_vm3, %v2611_v51 }
  0xcc   : > { %v3363_v57 = vsel %vm403_vm0, %v379_v9, %v3229_v0  ;;  %v3367_v44 = vsel %vm403_vm0, %v380_v21, %v3229_v0  ;;  %v3373_v2 = vsel %vm403_vm0, %v381_v25, %v3229_v0  ;;  %v3377_v62 = vsel %vm403_vm0, %v382_v35, %v3229_v0  ;;  %279 = vst.msk [vmem:[#allocation2 + $0xc8] sm:$0xf] %vm201_vm3, %v2611_v51 }
  0xcd   : > { %v3381_v7 = vsel %vm403_vm0, %v383_v41, %v3229_v0  ;;  %v3385_v9 = vsel %vm403_vm0, %v384_v33, %v3229_v0  ;;  %v3391_v25 = vsel %vm403_vm0, %v385_v46, %v3229_v0  ;;  %v3395_v35 = vsel %vm403_vm0, %v386_v30, %v3229_v0  ;;  %285 = vst.msk [vmem:[#allocation2 + $0xd8] sm:$0xf] %vm201_vm3, %v2611_v51 }
  0xce   : > { %291 = vst.msk [vmem:[#allocation2 + $0xe8] sm:$0xf] %vm201_vm3, %v2611_v51 }
  0xcf   : > { %297 = vst.msk [vmem:[#allocation2 + $0xf8] sm:$0xf] %vm201_vm3, %v2611_v51 }
  0xd0   : > { %301 = vst.msk [vmem:[#allocation2 + $0x100] sm:$0xf] %vm201_vm3, %v2611_v51 }
  0xd1   : > { %v3297_v58 = vpop.permute.xlu2 %1130  ;;  %302 = vst.msk [vmem:[#allocation2 + $0x104] sm:$0xf] %vm201_vm3, %v2611_v51 }
  0xd2   : > { %303 = vst.msk [vmem:[#allocation2 + $0x108] sm:$0xf] %vm201_vm3, %v2611_v51 }
  0xd9   : > { %v905_v21 = vpop.permute.xlu0 %904  ;;  %v3401_v33 = vpop.permute.xlu2 %1136 }
  0xda   : > { %v972_v12 = vsel %vm403_vm0, %v355_v19, %v905_v21  ;;  %v974_v41 = vsel %vm403_vm0, %v356_v16, %v905_v21  ;;  %v976_v54 = vsel %vm403_vm0, %v357_v52, %v905_v21  ;;  %v978_v48 = vsel %vm403_vm0, %v358_v28, %v905_v21 }
  0xdb   : > { %v980_v46 = vsel %vm403_vm0, %v359_v37, %v905_v21  ;;  %v982_v53 = vsel %vm403_vm0, %v360_v63, %v905_v21  ;;  %v984_v0 = vsel %vm403_vm0, %v361_v59, %v905_v21  ;;  %v986_v30 = vsel %vm403_vm0, %v362_v49, %v905_v21 }
  0xdc   : > { %v988_v16 = vsel %vm403_vm0, %v363_v50, %v905_v21  ;;  %v990_v40 = vsel %vm403_vm0, %v364_v6, %v905_v21  ;;  %v992_v52 = vsel %vm403_vm0, %v365_v10, %v905_v21  ;;  %v994_v28 = vsel %vm403_vm0, %v366_v15, %v905_v21  ;;  %v969_v10 = vpop.permute.xlu1 %968 }
  0xdd   : > { %v996_v37 = vsel %vm403_vm0, %v367_v18, %v905_v21  ;;  %v998_v63 = vsel %vm403_vm0, %v368_v60, %v905_v21  ;;  %v1000_v59 = vsel %vm403_vm0, %v369_v34, %v905_v21  ;;  %v1002_v49 = vsel %vm403_vm0, %v370_v38, %v905_v21 }
  0xde   : > { %v3425_v50 = vsel %vm1003_vm4, %v972_v12, %v3180_v43  ;;  %v3429_v6 = vsel %vm1003_vm4, %v974_v41, %v3190_v29  ;;  %v3435_v15 = vsel %vm1003_vm4, %v976_v54, %v3202_v22  ;;  %v3439_v18 = vsel %vm1003_vm4, %v978_v48, %v3159_v20 }
  0xdf   : > { %v3443_v43 = vsel %vm1003_vm4, %v980_v46, %v3174_v61  ;;  %v3447_v29 = vsel %vm1003_vm4, %v982_v53, %v3194_v11  ;;  %v3453_v22 = vsel %vm1003_vm4, %v984_v0, %v3212_v23  ;;  %v3457_v20 = vsel %vm1003_vm4, %v986_v30, %v3187_v55 }
  0xe0   : > { %v3461_v61 = vsel %vm1003_vm4, %v988_v16, %v3205_v17  ;;  %v3465_v11 = vsel %vm1003_vm4, %v992_v52, %v3199_v14  ;;  %v1023_v5 = vsel %vm1003_vm4, %v990_v40, %v3231_v27  ;;  %v3473_v23 = vsel %vm1003_vm4, %v994_v28, %v3214_v45 }
  0xe1   : > { %v3477_v55 = vsel %vm1003_vm4, %v996_v37, %v3319_v1  ;;  %v3481_v17 = vsel %vm1003_vm4, %v998_v63, %v3210_v4  ;;  %v1045_v14 = vpop.permute.xlu0 %1044  ;;  %v1033_v60 = vsel %vm1003_vm4, %v1000_v59, %v3255_v36  ;;  %v1035_v27 = vsel %vm1003_vm4, %v1002_v49, %v969_v10  ;;  %v3504_v38 = vpop.permute.xlu2 %1142 }
  0xe2   : > { %v1080_v45 = vsel %vm1003_vm4, %v3327_v24, %v1045_v14  ;;  %v1081_v42 = vsel %vm1003_vm4, %v3331_v47, %v1045_v14  ;;  %v1082_v4 = vsel %vm1003_vm4, %v3337_v32, %v1045_v14  ;;  %v1083_v36 = vsel %vm1003_vm4, %v3341_v3, %v1045_v14 }
  0xe3   : > { %v1084_v34 = vsel %vm1003_vm4, %v3345_v8, %v1045_v14  ;;  %v1085_v39 = vsel %vm1003_vm4, %v3349_v56, %v1045_v14  ;;  %v1086_v1 = vsel %vm1003_vm4, %v3355_v31, %v1045_v14  ;;  %v1087_v26 = vsel %vm1003_vm4, %v3359_v13, %v1045_v14 }
  0xe4   : > { %v1088_v19 = vsel %vm1003_vm4, %v3363_v57, %v1045_v14  ;;  %v1089_v24 = vsel %vm1003_vm4, %v3367_v44, %v1045_v14  ;;  %v1090_v47 = vsel %vm1003_vm4, %v3373_v2, %v1045_v14  ;;  %v1091_v32 = vsel %vm1003_vm4, %v3377_v62, %v1045_v14 }
  0xe5   : > { %v1092_v3 = vsel %vm1003_vm4, %v3381_v7, %v1045_v14  ;;  %v1093_v8 = vsel %vm1003_vm4, %v3385_v9, %v1045_v14  ;;  %v1094_v56 = vsel %vm1003_vm4, %v3391_v25, %v1045_v14  ;;  %v1095_v31 = vsel %vm1003_vm4, %v3395_v35, %v1045_v14 }
  0xe6   : > { %v1320_v13 = vrot.slane %v1080_v45, 4  ;;  %v1321_v57 = vrot.slane %v1081_v42, 4  ;;  %v1322_v44 = vrot.slane %v1082_v4, 4  ;;  %v1323_v2 = vrot.slane %v1083_v36, 4 }
  0xe7   : > { %v1324_v62 = vrot.slane %v1084_v34, 4  ;;  %v1325_v7 = vrot.slane %v1085_v39, 4  ;;  %v1326_v9 = vrot.slane %v1086_v1, 4  ;;  %v1327_v21 = vrot.slane %v1087_v26, 4 }
  0xe8   : > { %v1328_v12 = vrot.slane %v1088_v19, 4  ;;  %v1329_v41 = vrot.slane %v1089_v24, 4  ;;  %v1330_v25 = vrot.slane %v1090_v47, 4  ;;  %v1331_v35 = vrot.slane %v1091_v32, 4 }
  0xe9   : > { %v1332_v54 = vrot.slane %v1092_v3, 4  ;;  %v1333_v48 = vrot.slane %v1093_v8, 4  ;;  %v1334_v46 = vrot.slane %v1094_v56, 4  ;;  %v1335_v53 = vrot.slane %v1095_v31, 4 }
  0xea   : > { %v1338_v0 = vsel %vm1336_vm5, %v3425_v50, %v1320_v13  ;;  %v1340_v30 = vsel %vm1336_vm5, %v3429_v6, %v1321_v57  ;;  %v1342_v16 = vsel %vm1336_vm5, %v3435_v15, %v1322_v44  ;;  %v1344_v40 = vsel %vm1336_vm5, %v3439_v18, %v1323_v2 }
  0xeb   : > { %v1346_v52 = vsel %vm1336_vm5, %v3443_v43, %v1324_v62  ;;  %v3552_v28 = vsel %vm1336_vm5, %v3447_v29, %v1325_v7  ;;  %v3558_v37 = vsel %vm1336_vm5, %v3453_v22, %v1326_v9  ;;  %v3562_v63 = vsel %vm1336_vm5, %v3457_v20, %v1327_v21  ;;  %v3599_v29 = vpop.permute.xlu2 %1148  ;;  %v3601_v22 = vpop.permute.xlu1 %1128 }
  0xec   : > { %v3566_v59 = vsel %vm1336_vm5, %v3461_v61, %v1328_v12  ;;  %v3569_v49 = vsel %vm1336_vm5, %v1023_v5, %v1329_v41  ;;  %v3575_v50 = vsel %vm1336_vm5, %v3465_v11, %v1330_v25  ;;  %v3579_v6 = vsel %vm1336_vm5, %v3473_v23, %v1331_v35 }
  0xed   : > { %v3583_v10 = vsel %vm1336_vm5, %v3477_v55, %v1332_v54  ;;  %v3587_v15 = vsel %vm1336_vm5, %v3481_v17, %v1333_v48  ;;  %v3592_v18 = vsel %vm1336_vm5, %v1033_v60, %v1334_v46  ;;  %v3595_v43 = vsel %vm1336_vm5, %v1035_v27, %v1335_v53  ;;  %v3619_v27 = vpop.permute.xlu0 %1132 }
  0xee   : > { %v1401_v20 = vunpack.c.l.b16 %v1338_v0  ;;  %v1402_v61 = vunpack.c.h.b16 %v1338_v0  ;;  %v1404_v11 = vunpack.c.l.b16 %v1340_v30  ;;  %v1405_v5 = vunpack.c.h.b16 %v1340_v30 }
  0xef   : > { %v1407_v23 = vunpack.c.l.b16 %v1342_v16  ;;  %v1408_v55 = vunpack.c.h.b16 %v1342_v16  ;;  %v1410_v17 = vunpack.c.l.b16 %v1344_v40  ;;  %v1411_v42 = vunpack.c.h.b16 %v1344_v40 }
  0xf0   : > { %v1449_v14 = vpack.c.b16 %v1401_v20, %v1401_v20  ;;  %v1450_v60 = vpack.c.b16 %v1402_v61, %v1402_v61  ;;  %v1452_v4 = vpack.c.b16 %v1404_v11, %v1404_v11  ;;  %v1453_v36 = vpack.c.b16 %v1405_v5, %v1405_v5  ;;  %v2550_v61 = vld [vmem:[%s2671_s24 + $0x10] sm:$0xff] }
  0xf1   : > { %v1413_v39 = vunpack.c.l.b16 %v1346_v52  ;;  %v1455_v1 = vpack.c.b16 %v1407_v23, %v1407_v23  ;;  %v1414_v26 = vunpack.c.h.b16 %v1346_v52  ;;  %v1456_v19 = vpack.c.b16 %v1408_v55, %v1408_v55  ;;  %v2551_v55 = vld [vmem:[%s2671_s24 + $0x58] sm:$0xff] }
  0xf2   : > { %1545 = vst.msk [vmem:[#allocation2] sm:$0xf] %vm201_vm3, %v1449_v14  ;;  %v1416_v24 = vunpack.c.l.b16 %v3552_v28  ;;  %v1458_v47 = vpack.c.b16 %v1410_v17, %v1410_v17  ;;  %v1417_v32 = vunpack.c.h.b16 %v3552_v28  ;;  %v1459_v3 = vpack.c.b16 %v1411_v42, %v1411_v42 }
  0xf3   : > { %v3621_v45 = vpop.permute.xlu2 %1154  ;;  %v3625_v34 = vpop.permute.xlu1 %1134  ;;  %1546 = vst.msk [vmem:[#allocation2 + $0x4] sm:$0xf] %vm201_vm3, %v1450_v60  ;;  %v1419_v51 = vunpack.c.l.b16 %v3558_v37  ;;  %v1461_v8 = vpack.c.b16 %v1413_v39, %v1413_v39  ;;  %v1420_v56 = vunpack.c.h.b16 %v3558_v37  ;;  %v1462_v31 = vpack.c.b16 %v1414_v26, %v1414_v26  ;;  %v2552_v60 = vld [vmem:[%s2671_s24 + $0xa0] sm:$0xff] }
  0xf4   : > { %1548 = vst.msk [vmem:[#allocation2 + $0x10] sm:$0xf] %vm201_vm3, %v1452_v4  ;;  %v1422_v13 = vunpack.c.l.b16 %v3562_v63  ;;  %v1464_v57 = vpack.c.b16 %v1416_v24, %v1416_v24  ;;  %v1423_v62 = vunpack.c.h.b16 %v3562_v63  ;;  %v1465_v7 = vpack.c.b16 %v1417_v32, %v1417_v32 }
  0xf5   : > { %1549 = vst.msk [vmem:[#allocation2 + $0x14] sm:$0xf] %vm201_vm3, %v1453_v36  ;;  %v3639_v44 = vpop.permute.xlu0 %1138  ;;  %v1425_v21 = vunpack.c.l.b16 %v3566_v59  ;;  %v1467_v12 = vpack.c.b16 %v1419_v51, %v1419_v51  ;;  %v1426_v41 = vunpack.c.h.b16 %v3566_v59  ;;  %v1468_v25 = vpack.c.b16 %v1420_v56, %v1420_v56 }
  0xf6   : > { %1551 = vst.msk [vmem:[#allocation2 + $0x20] sm:$0xf] %vm201_vm3, %v1455_v1  ;;  %v1428_v35 = vunpack.c.l.b16 %v3569_v49  ;;  %v1470_v54 = vpack.c.b16 %v1422_v13, %v1422_v13  ;;  %v1429_v48 = vunpack.c.h.b16 %v3569_v49  ;;  %v1471_v46 = vpack.c.b16 %v1423_v62, %v1423_v62 }
  0xf7   : > { %1552 = vst.msk [vmem:[#allocation2 + $0x24] sm:$0xf] %vm201_vm3, %v1456_v19  ;;  %v1431_v53 = vunpack.c.l.b16 %v3575_v50  ;;  %v1473_v0 = vpack.c.b16 %v1425_v21, %v1425_v21  ;;  %v1432_v30 = vunpack.c.h.b16 %v3575_v50  ;;  %v1474_v16 = vpack.c.b16 %v1426_v41, %v1426_v41 }
  0xf8   : > { %1554 = vst.msk [vmem:[#allocation2 + $0x30] sm:$0xf] %vm201_vm3, %v1458_v47  ;;  %v1434_v40 = vunpack.c.l.b16 %v3579_v6  ;;  %v1476_v52 = vpack.c.b16 %v1428_v35, %v1428_v35  ;;  %v1435_v63 = vunpack.c.h.b16 %v3579_v6  ;;  %v1477_v59 = vpack.c.b16 %v1429_v48, %v1429_v48 }
  0xf9   : > { %1555 = vst.msk [vmem:[#allocation2 + $0x34] sm:$0xf] %vm201_vm3, %v1459_v3  ;;  %v1437_v50 = vunpack.c.l.b16 %v3583_v10  ;;  %v1479_v20 = vpack.c.b16 %v1431_v53, %v1431_v53  ;;  %v387_v11 = vpack.c.bf16 %v2550_v61, %v2550_v61  ;;  %v1438_v5 = vunpack.c.h.b16 %v3583_v10 }
  0xfa   : > { %1557 = vst.msk [vmem:[#allocation2 + $0x40] sm:$0xf] %vm201_vm3, %v1461_v8  ;;  %v1480_v23 = vpack.c.b16 %v1432_v30, %v1432_v30  ;;  %v390_v17 = vpack.c.bf16 %v2551_v55, %v2551_v55  ;;  %v1440_v6 = vunpack.c.l.b16 %v3587_v15  ;;  %v1482_v14 = vpack.c.b16 %v1434_v40, %v1434_v40 }
  0xfb   : > { %v1193_v2 = vpop.permute.xlu2 %1192  ;;  %v1141_v9 = vpop.permute.xlu1 %1140  ;;  %1558 = vst.msk [vmem:[#allocation2 + $0x44] sm:$0xf] %vm201_vm3, %v1462_v31  ;;  %v393_v42 = vpack.c.bf16 %v2552_v60, %v2552_v60  ;;  %v1441_v4 = vunpack.c.h.b16 %v3587_v15  ;;  %v1483_v36 = vpack.c.b16 %v1435_v63, %v1435_v63  ;;  %v1443_v39 = vunpack.c.l.b16 %v3592_v18 }
  0xfc   : > { %1560 = vst.msk [vmem:[#allocation2 + $0x50] sm:$0xf] %vm201_vm3, %v1464_v57  ;;  %v1485_v10 = vpack.c.b16 %v1437_v50, %v1437_v50  ;;  %v1226_v1 = vsel %vm403_vm0, %v387_v11, %v3601_v22  ;;  %v1444_v26 = vunpack.c.h.b16 %v3592_v18  ;;  %v1486_v19 = vpack.c.b16 %v1438_v5, %v1438_v5 }
  0xfd   : > { %1561 = vst.msk [vmem:[#allocation2 + $0x54] sm:$0xf] %vm201_vm3, %v1465_v7  ;;  %v3657_v28 = vpop.permute.xlu0 %1144  ;;  %v1235_v24 = vsel %vm403_vm0, %v390_v17, %v3625_v34  ;;  %v1273_v15 = vsel %vm1003_vm4, %v1226_v1, %v1193_v2  ;;  %v1446_v47 = vunpack.c.l.b16 %v3595_v43  ;;  %v1488_v32 = vpack.c.b16 %v1440_v6, %v1440_v6 }
  0xfe   : > { %1563 = vst.msk [vmem:[#allocation2 + $0x60] sm:$0xf] %vm201_vm3, %v1467_v12  ;;  %v1244_v3 = vsel %vm403_vm0, %v393_v42, %v1141_v9  ;;  %v1447_v8 = vunpack.c.h.b16 %v3595_v43  ;;  %v1489_v56 = vpack.c.b16 %v1441_v4, %v1441_v4  ;;  %v1491_v13 = vpack.c.b16 %v1443_v39, %v1443_v39  ;;  %v2553_v9 = vld [vmem:[%s2671_s24 + $0xe8] sm:$0xff]  ;;  %v2557_v42 = vld [vmem:[%s2671_s24 + $0x70] sm:$0xff] }
  0xff   : > { %1564 = vst.msk [vmem:[#allocation2 + $0x64] sm:$0xf] %vm201_vm3, %v1468_v25  ;;  %v1403_v57 = vunpack.c.l.b16 %v1273_v15  ;;  %v1492_v2 = vpack.c.b16 %v1444_v26, %v1444_v26  ;;  %v1494_v7 = vpack.c.b16 %v1446_v47, %v1446_v47  ;;  %v396_v21 = vpack.c.bf16 %v2553_v9, %v2553_v9 }
 0x100   : > { %1566 = vst.msk [vmem:[#allocation2 + $0x70] sm:$0xf] %vm201_vm3, %v1470_v54  ;;  %v1495_v12 = vpack.c.b16 %v1447_v8, %v1447_v8  ;;  %v391_v4 = vpack.c.bf16 %v2557_v42, %v2557_v42  ;;  %v214_v8 = vld [vmem:[#allocation2 + $0x1c] sm:$0x1] }
 0x101   : > { %1567 = vst.msk [vmem:[#allocation2 + $0x74] sm:$0xf] %vm201_vm3, %v1471_v46  ;;  %v1451_v41 = vpack.c.b16 %v1403_v57, %v1403_v57  ;;  %v226_v57 = vld [vmem:[#allocation2 + $0x3c] sm:$0x1] }
 0x102   : > { %1569 = vst.msk [vmem:[#allocation2 + $0x80] sm:$0xf] %vm201_vm3, %v1473_v0 }
 0x103   : > { %v1199_v37 = vpop.permute.xlu2 %1198  ;;  %v1147_v49 = vpop.permute.xlu1 %1146  ;;  %1570 = vst.msk [vmem:[#allocation2 + $0x84] sm:$0xf] %vm201_vm3, %v1474_v16  ;;  %v2554_v16 = vld [vmem:[%s2671_s24 + $0x28] sm:$0xff] }
 0x104   : > { %1572 = vst.msk [vmem:[#allocation2 + $0x90] sm:$0xf] %vm201_vm3, %v1476_v52  ;;  %v1279_v51 = vsel %vm1003_vm4, %v1235_v24, %v1199_v37  ;;  %v1253_v35 = vsel %vm403_vm0, %v396_v21, %v1147_v49  ;;  %v388_v40 = vpack.c.bf16 %v2554_v16, %v2554_v16  ;;  %v2555_v52 = vld [vmem:[%s2671_s24 + $0x130] sm:$0xff]  ;;  %v244_v16 = vld [vmem:[#allocation2 + $0x6c] sm:$0x1] }
 0x105   : > { %1573 = vst.msk [vmem:[#allocation2 + $0x94] sm:$0xf] %vm201_vm3, %v1477_v59  ;;  %v3685_v22 = vpop.permute.xlu0 %1150  ;;  %v1412_v62 = vunpack.c.l.b16 %v1279_v51  ;;  %v399_v37 = vpack.c.bf16 %v2555_v52, %v2555_v52  ;;  %v2556_v59 = vld [vmem:[%s2671_s24 + $0x40] sm:$0xff]  ;;  %v250_v52 = vld [vmem:[#allocation2 + $0x7c] sm:$0x1] }
 0x106   : > { %1575 = vst.msk [vmem:[#allocation2 + $0xa0] sm:$0xf] %vm201_vm3, %v1479_v20  ;;  %v389_v49 = vpack.c.bf16 %v2556_v59, %v2556_v59  ;;  %v1229_v50 = vsel %vm403_vm0, %v388_v40, %v3297_v58 }
 0x107   : > { %1576 = vst.msk [vmem:[#allocation2 + $0xa4] sm:$0xf] %vm201_vm3, %v1480_v23  ;;  %v1460_v25 = vpack.c.b16 %v1412_v62, %v1412_v62 }
 0x108   : > { %1578 = vst.msk [vmem:[#allocation2 + $0xb0] sm:$0xf] %vm201_vm3, %v1482_v14  ;;  %v1232_v5 = vsel %vm403_vm0, %v389_v49, %v3619_v27  ;;  %v1238_v27 = vsel %vm403_vm0, %v391_v4, %v3401_v33  ;;  %v274_v4 = vld [vmem:[#allocation2 + $0xbc] sm:$0x1] }
 0x109   : > { %1579 = vst.msk [vmem:[#allocation2 + $0xb4] sm:$0xf] %vm201_vm3, %v1483_v36  ;;  %v2558_v36 = vld [vmem:[%s2671_s24 + $0x88] sm:$0xff] }
 0x10a   : > { %1581 = vst.msk [vmem:[#allocation2 + $0xc0] sm:$0xf] %vm201_vm3, %v1485_v10  ;;  %v392_v39 = vpack.c.bf16 %v2558_v36, %v2558_v36  ;;  %v2559_v10 = vld [vmem:[%s2671_s24 + $0x178] sm:$0xff] }
 0x10b   : > { %v1205_v18 = vpop.permute.xlu2 %1204  ;;  %v1153_v31 = vpop.permute.xlu1 %1152  ;;  %1582 = vst.msk [vmem:[#allocation2 + $0xc4] sm:$0xf] %vm201_vm3, %v1486_v19  ;;  %v402_v1 = vpack.c.bf16 %v2559_v10, %v2559_v10 }
 0x10c   : > { %v1285_v34 = vsel %vm1003_vm4, %v1244_v3, %v1205_v18  ;;  %1584 = vst.msk [vmem:[#allocation2 + $0xd0] sm:$0xf] %vm201_vm3, %v1488_v32  ;;  %v1262_v20 = vsel %vm403_vm0, %v399_v37, %v1153_v31  ;;  %v1241_v15 = vsel %vm403_vm0, %v392_v39, %v3639_v44  ;;  %v208_v18 = vld [vmem:[#allocation2 + $0xc] sm:$0x1]  ;;  %v215_v31 = vsel %vm3729_vm8, 0, %v214_v8 }
 0x10d   : > { %v1421_v43 = vunpack.c.l.b16 %v1285_v34  ;;  %1585 = vst.msk [vmem:[#allocation2 + $0xd4] sm:$0xf] %vm201_vm3, %v1489_v56  ;;  %v3699_v48 = vpop.permute.xlu0 %1156  ;;  %v209_v44 = vsel %vm3729_vm8, 0, %v208_v18 }
 0x10e   : > { %1587 = vst.msk [vmem:[#allocation2 + $0xe0] sm:$0xf] %vm201_vm3, %v1491_v13  ;;  %v220_v13 = vld [vmem:[#allocation2 + $0x2c] sm:$0x1] }
 0x10f   : > { %1588 = vst.msk [vmem:[#allocation2 + $0xe4] sm:$0xf] %vm201_vm3, %v1492_v2  ;;  %v1469_v54 = vpack.c.b16 %v1421_v43, %v1421_v43  ;;  %v221_v9 = vsel %vm3729_vm8, 0, %v220_v13  ;;  %v227_v43 = vsel %vm3729_vm8, 0, %v226_v57  ;;  %v304_v13 = vld [vmem:[#allocation2 + $0x10c] sm:$0x1] }
 0x110   : > { %1590 = vst.msk [vmem:[#allocation2 + $0xf0] sm:$0xf] %vm201_vm3, %v1494_v7 }
 0x111   : > { %1591 = vst.msk [vmem:[#allocation2 + $0xf4] sm:$0xf] %vm201_vm3, %v1495_v12  ;;  %v232_v12 = vld [vmem:[#allocation2 + $0x4c] sm:$0x1] }
 0x112   : > { %1547 = vst.msk [vmem:[#allocation2 + $0x8] sm:$0xf] %vm201_vm3, %v1451_v41  ;;  %v2560_v41 = vld [vmem:[%s2671_s24 + $0xb8] sm:$0xff]  ;;  %v233_v40 = vsel %vm3729_vm8, 0, %v232_v12 }
 0x113   : > { %v1211_v46 = vpop.permute.xlu2 %1210  ;;  %v1159_v0 = vpop.permute.xlu1 %1158  ;;  %1556 = vst.msk [vmem:[#allocation2 + $0x38] sm:$0xf] %vm201_vm3, %v1460_v25  ;;  %v394_v25 = vpack.c.bf16 %v2560_v41, %v2560_v41 }
 0x114   : > { %v1291_v53 = vsel %vm1003_vm4, %v1253_v35, %v1211_v46  ;;  %1565 = vst.msk [vmem:[#allocation2 + $0x68] sm:$0xf] %vm201_vm3, %v1469_v54  ;;  %v1271_v47 = vsel %vm403_vm0, %v402_v1, %v1159_v0  ;;  %v238_v46 = vld [vmem:[#allocation2 + $0x5c] sm:$0x1]  ;;  %v280_v1 = vld [vmem:[#allocation2 + $0xcc] sm:$0x1] }
 0x115   : > { %v1430_v30 = vunpack.c.l.b16 %v1291_v53  ;;  %v1195_v61 = vpop.permute.xlu0 %1194  ;;  %210 = vst [vmem:[#allocation2 + $0xc] sm:$0x1] %v209_v44  ;;  %v2561_v53 = vld [vmem:[%s2671_s24 + $0xd0] sm:$0xff]  ;;  %v239_v37 = vsel %vm3729_vm8, 0, %v238_v46  ;;  %v1247_v59 = vsel %vm403_vm0, %v394_v25, %v3504_v38  ;;  %v298_v44 = vld [vmem:[#allocation2 + $0xfc] sm:$0x1] }
 0x116   : > { %v1275_v23 = vsel %vm1003_vm4, %v1229_v50, %v1195_v61  ;;  %216 = vst [vmem:[#allocation2 + $0x1c] sm:$0x1] %v215_v31  ;;  %v395_v0 = vpack.c.bf16 %v2561_v53, %v2561_v53  ;;  %v245_v50 = vsel %vm3729_vm8, 0, %v244_v16 }
 0x117   : > { %v1478_v63 = vpack.c.b16 %v1430_v30, %v1430_v30  ;;  %v1406_v6 = vunpack.c.l.b16 %v1275_v23  ;;  %222 = vst [vmem:[#allocation2 + $0x2c] sm:$0x1] %v221_v9 }
 0x118   : > { %228 = vst [vmem:[#allocation2 + $0x3c] sm:$0x1] %v227_v43  ;;  %v305_v43 = vsel %vm3729_vm8, 0, %v304_v13 }
 0x119   : > { %1574 = vst.msk [vmem:[#allocation2 + $0x98] sm:$0xf] %vm201_vm3, %v1478_v63  ;;  %v1454_v26 = vpack.c.b16 %v1406_v6, %v1406_v6  ;;  %v256_v63 = vld [vmem:[#allocation2 + $0x8c] sm:$0x1] }
 0x11a   : > { %234 = vst [vmem:[#allocation2 + $0x4c] sm:$0x1] %v233_v40 }
 0x11b   : > { %v1217_v11 = vpop.permute.xlu2 %1216  ;;  %v1197_v17 = vpop.permute.xlu1 %1196  ;;  %1550 = vst.msk [vmem:[#allocation2 + $0x18] sm:$0xf] %vm201_vm3, %v1454_v26 }
 0x11c   : > { %v1297_v55 = vsel %vm1003_vm4, %v1262_v20, %v1217_v11  ;;  %v1277_v60 = vsel %vm1003_vm4, %v1232_v5, %v1197_v17  ;;  %v1250_v20 = vsel %vm403_vm0, %v395_v0, %v3657_v28  ;;  %v251_v5 = vsel %vm3729_vm8, 0, %v250_v52  ;;  %240 = vst [vmem:[#allocation2 + $0x5c] sm:$0x1] %v239_v37  ;;  %v262_v17 = vld [vmem:[#allocation2 + $0x9c] sm:$0x1]  ;;  %v2562_v28 = vld [vmem:[%s2671_s24 + $0x100] sm:$0xff] }
 0x11d   : > { %v1439_v14 = vunpack.c.l.b16 %v1297_v55  ;;  %v1409_v58 = vunpack.c.l.b16 %v1277_v60  ;;  %v1201_v32 = vpop.permute.xlu0 %1200  ;;  %v257_v55 = vsel %vm3729_vm8, 0, %v256_v63  ;;  %246 = vst [vmem:[#allocation2 + $0x6c] sm:$0x1] %v245_v50  ;;  %v397_v60 = vpack.c.bf16 %v2562_v28, %v2562_v28 }
 0x11e   : > { %v1281_v56 = vsel %vm1003_vm4, %v1238_v27, %v1201_v32  ;;  %252 = vst [vmem:[#allocation2 + $0x7c] sm:$0x1] %v251_v5  ;;  %v263_v10 = vsel %vm3729_vm8, 0, %v262_v17  ;;  %v292_v27 = vld [vmem:[#allocation2 + $0xec] sm:$0x1]  ;;  %v281_v32 = vsel %vm3729_vm8, 0, %v280_v1 }
 0x11f   : > { %v1487_v19 = vpack.c.b16 %v1439_v14, %v1439_v14  ;;  %v1457_v24 = vpack.c.b16 %v1409_v58, %v1409_v58  ;;  %v1415_v2 = vunpack.c.l.b16 %v1281_v56  ;;  %v268_v14 = vld [vmem:[#allocation2 + $0xac] sm:$0x1]  ;;  %v2563_v58 = vld [vmem:[%s2671_s24 + $0x118] sm:$0xff]  ;;  %258 = vst [vmem:[#allocation2 + $0x8c] sm:$0x1] %v257_v55 }
 0x120   : > { %v398_v36 = vpack.c.bf16 %v2563_v58, %v2563_v58  ;;  %v269_v26 = vsel %vm3729_vm8, 0, %v268_v14  ;;  %264 = vst [vmem:[#allocation2 + $0x9c] sm:$0x1] %v263_v10 }
 0x121   : > { %1583 = vst.msk [vmem:[#allocation2 + $0xc8] sm:$0xf] %vm201_vm3, %v1487_v19  ;;  %v1463_v35 = vpack.c.b16 %v1415_v2, %v1415_v2  ;;  %v286_v19 = vld [vmem:[#allocation2 + $0xdc] sm:$0x1] }
 0x122   : > { %1553 = vst.msk [vmem:[#allocation2 + $0x28] sm:$0xf] %vm201_vm3, %v1457_v24  ;;  %v275_v24 = vsel %vm3729_vm8, 0, %v274_v4  ;;  %v287_v56 = vsel %vm3729_vm8, 0, %v286_v19 }
 0x123   : > { %v1223_v3 = vpop.permute.xlu2 %1222  ;;  %v1203_v34 = vpop.permute.xlu1 %1202  ;;  %1559 = vst.msk [vmem:[#allocation2 + $0x48] sm:$0xf] %vm201_vm3, %v1463_v35 }
 0x124   : > { %v1303_v33 = vsel %vm1003_vm4, %v1271_v47, %v1223_v3  ;;  %v1283_v7 = vsel %vm1003_vm4, %v1241_v15, %v1203_v34  ;;  %v1256_v15 = vsel %vm403_vm0, %v397_v60, %v3599_v29  ;;  %v1259_v3 = vsel %vm403_vm0, %v398_v36, %v3685_v22  ;;  %270 = vst [vmem:[#allocation2 + $0xac] sm:$0x1] %v269_v26  ;;  %v2564_v22 = vld [vmem:[%s2671_s24 + $0x148] sm:$0xff] }
 0x125   : > { %v1448_v62 = vunpack.c.l.b16 %v1303_v33  ;;  %v1418_v21 = vunpack.c.l.b16 %v1283_v7  ;;  %v1207_v49 = vpop.permute.xlu0 %1206  ;;  %276 = vst [vmem:[#allocation2 + $0xbc] sm:$0x1] %v275_v24  ;;  %v293_v34 = vsel %vm3729_vm8, 0, %v292_v27  ;;  %v400_v57 = vpack.c.bf16 %v2564_v22, %v2564_v22 }
 0x126   : > { %v1287_v61 = vsel %vm1003_vm4, %v1247_v59, %v1207_v49  ;;  %282 = vst [vmem:[#allocation2 + $0xcc] sm:$0x1] %v281_v32 }
 0x127   : > { %v1496_v54 = vpack.c.b16 %v1448_v62, %v1448_v62  ;;  %v1466_v30 = vpack.c.b16 %v1418_v21, %v1418_v21  ;;  %v1424_v23 = vunpack.c.l.b16 %v1287_v61  ;;  %288 = vst [vmem:[#allocation2 + $0xdc] sm:$0x1] %v287_v56  ;;  %v2565_v62 = vld [vmem:[%s2671_s24 + $0x160] sm:$0xff]  ;;  %v299_v21 = vsel %vm3729_vm8, 0, %v298_v44 }
 0x128   : > { %v401_v7 = vpack.c.bf16 %v2565_v62, %v2565_v62  ;;  %294 = vst [vmem:[#allocation2 + $0xec] sm:$0x1] %v293_v34  ;;  %v1265_v12 = vsel %vm403_vm0, %v400_v57, %v3621_v45 }
 0x129   : > { %1592 = vst.msk [vmem:[#allocation2 + $0xf8] sm:$0xf] %vm201_vm3, %v1496_v54  ;;  %v1472_v42 = vpack.c.b16 %v1424_v23, %v1424_v23 }
 0x12a   : > { %1562 = vst.msk [vmem:[#allocation2 + $0x58] sm:$0xf] %vm201_vm3, %v1466_v30  ;;  %v1268_v25 = vsel %vm403_vm0, %v401_v7, %v3699_v48 }
 0x12b   : > { %v1209_v11 = vpop.permute.xlu1 %1208  ;;  %1568 = vst.msk [vmem:[#allocation2 + $0x78] sm:$0xf] %vm201_vm3, %v1472_v42 }
 0x12c   : > { %v1289_v38 = vsel %vm1003_vm4, %v1250_v20, %v1209_v11  ;;  %300 = vst [vmem:[#allocation2 + $0xfc] sm:$0x1] %v299_v21 }
 0x12d   : > { %v1427_v6 = vunpack.c.l.b16 %v1289_v38  ;;  %v1213_v47 = vpop.permute.xlu0 %1212  ;;  %306 = vst [vmem:[#allocation2 + $0x10c] sm:$0x1] %v305_v43 }
 0x12e   : > { %v1293_v18 = vsel %vm1003_vm4, %v1256_v15, %v1213_v47 }
 0x12f   : > { %v1475_v39 = vpack.c.b16 %v1427_v6, %v1427_v6  ;;  %v1433_v33 = vunpack.c.l.b16 %v1293_v18 }
 0x131   : > { %1571 = vst.msk [vmem:[#allocation2 + $0x88] sm:$0xf] %vm201_vm3, %v1475_v39  ;;  %v1481_v2 = vpack.c.b16 %v1433_v33, %v1433_v33 }
 0x133   : > { %v1215_v8 = vpop.permute.xlu1 %1214  ;;  %1577 = vst.msk [vmem:[#allocation2 + $0xa8] sm:$0xf] %vm201_vm3, %v1481_v2 }
 0x134   : > { %v1295_v29 = vsel %vm1003_vm4, %v1259_v3, %v1215_v8 }
 0x135   : > { %v1436_v31 = vunpack.c.l.b16 %v1295_v29  ;;  %v1219_v41 = vpop.permute.xlu0 %1218 }
 0x136   : > { %v1299_v35 = vsel %vm1003_vm4, %v1265_v12, %v1219_v41 }
 0x137   : > { %v1484_v9 = vpack.c.b16 %v1436_v31, %v1436_v31  ;;  %v1442_v46 = vunpack.c.l.b16 %v1299_v35 }
 0x139   : > { %1580 = vst.msk [vmem:[#allocation2 + $0xb8] sm:$0xf] %vm201_vm3, %v1484_v9  ;;  %v1490_v51 = vpack.c.b16 %v1442_v46, %v1442_v46 }
 0x13b   : > { %v1221_v54 = vpop.permute.xlu1 %1220  ;;  %1586 = vst.msk [vmem:[#allocation2 + $0xd8] sm:$0xf] %vm201_vm3, %v1490_v51 }
 0x13c   : > { %v1301_v53 = vsel %vm1003_vm4, %v1268_v25, %v1221_v54 }
 0x13d   : > { %v1445_v0 = vunpack.c.l.b16 %v1301_v53 }
 0x13f   : > { %v1493_v30 = vpack.c.b16 %v1445_v0, %v1445_v0 }
 0x141   : > { %1589 = vst.msk [vmem:[#allocation2 + $0xe8] sm:$0xf] %vm201_vm3, %v1493_v30 }
 0x142 PF: > { %s2473_s6 = sshll.u32 %s2589_s12, 7  ;;  %vm1721_vm9 = vsmask.f32 7424  ;;  %s2612_s8 = smov 24   ;;  %vm1964_vm10 = vcmask 97280   ;;  %vm2005_vm11 = vcmask 195584  }
 0x143   : > { %s3804_s7 = scalar_lea.vmem [#allocation2], %s2473_s6  ;;  %s2613_s9 = smov 12   ;;  %vm2038_vm12 = vcmask 293888   ;;  %vm2151_vm13 = vcmask 392192   ;;  %vm2281_vm14 = vcmask 257024  }
 0x144   : > { %s2614_s10 = smov 36  }
 0x148   : > { %v3807_v45 = vld [vmem:[%s3804_s7 + $0x50] sm:$0xff]  ;;  %v3810_v48 = vld [vmem:[%s3804_s7 + $0x40] sm:$0xff]  ;;  %v1615_v16 = vld [vmem:[%s3804_s7 + $0x48] sm:$0xf] }
 0x149   : > { %v1616_v40 = vld [vmem:[%s3804_s7 + $0x4c] sm:$0x1]  ;;  %v3814_v52 = vunpack.c.l.b16 %v1615_v16  ;;  %v3817_v37 = vld [vmem:[%s3804_s7 + $0x60] sm:$0xff]  ;;  %1898 = vrot.lane.b32.xlu1 %v3807_v45, %s2612_s8  ;;  %v1783_v59 = vshrl.u32 %v3810_v48, 16  ;;  %v1785_v49 = vshll.u32 %v3810_v48, 16  ;;  %v1798_v42 = vshrl.u32 %v3807_v45, 16 }
 0x14a   : > { %v1709_v63 = vunpack.c.l.b16 %v1616_v40  ;;  %v1623_v50 = vld [vmem:[%s3804_s7 + $0x68] sm:$0xf]  ;;  %v1624_v20 = vld [vmem:[%s3804_s7 + $0x6c] sm:$0x1]  ;;  %v1813_v5 = vshrl.u32 %v3817_v37, 16  ;;  %v1815_v23 = vshll.u32 %v3817_v37, 16 }
 0x14b   : > { %v3825_v61 = vunpack.c.l.b16 %v1623_v50  ;;  %v1711_v11 = vunpack.c.l.b16 %v1624_v20  ;;  %v3830_v38 = vld [vmem:[%s3804_s7 + $0x20] sm:$0xff]  ;;  %v1607_v55 = vld [vmem:[%s3804_s7 + $0x28] sm:$0xf]  ;;  %v1787_v6 = vrot.slane %v1785_v49, 1  ;;  %v1608_v14 = vld [vmem:[%s3804_s7 + $0x2c] sm:$0x1] }
 0x14c   : > { %v3834_v17 = vpack.c.b16 %v1709_v63, %v3814_v52  ;;  %v3837_v28 = vunpack.c.l.b16 %v1607_v55  ;;  %v1619_v60 = vld [vmem:[%s3804_s7 + $0x58] sm:$0xf]  ;;  %v1817_v58 = vrot.slane %v1815_v23, 1  ;;  %v1707_v36 = vunpack.c.l.b16 %v1608_v14  ;;  %v1620_v10 = vld [vmem:[%s3804_s7 + $0x5c] sm:$0x1]  ;;  %v3849_v24 = vld [vmem:[%s3804_s7 + $0x70] sm:$0xff] }
 0x14d   : > { %v3842_v4 = vpack.c.b16 %v1711_v11, %v3825_v61  ;;  %v1753_v39 = vshrl.u32 %v3830_v38, 16  ;;  %v1599_v1 = vld [vmem:[%s3804_s7 + $0x8] sm:$0xf]  ;;  %v1788_v26 = vor.u32 %v1787_v6, %v1783_v59  ;;  %v1755_v27 = vshll.u32 %v3830_v38, 16  ;;  %v1600_v47 = vld [vmem:[%s3804_s7 + $0xc] sm:$0x1] }
 0x14e   : > { %v1790_v19 = vshll.u32 %v3834_v17, 16  ;;  %v3852_v15 = vunpack.c.l.b16 %v1619_v60  ;;  %v1818_v32 = vor.u32 %v1817_v58, %v1813_v5  ;;  %v3857_v18 = vpack.c.b16 %v1707_v36, %v3837_v28  ;;  %v3863_v34 = vld [vmem:[%s3804_s7] sm:$0xff]  ;;  %v1603_v2 = vld [vmem:[%s3804_s7 + $0x18] sm:$0xf]  ;;  %v1604_v62 = vld [vmem:[%s3804_s7 + $0x1c] sm:$0x1] }
 0x14f   : > { %v1820_v3 = vshll.u32 %v3842_v4, 16  ;;  %v1710_v8 = vunpack.c.l.b16 %v1620_v10  ;;  %v1757_v33 = vrot.slane %v1755_v27, 1  ;;  %v1800_v29 = vshll.u32 %v3807_v45, 16  ;;  %v3882_v43 = vld [vmem:[%s3804_s7 + $0x10] sm:$0xff]  ;;  %v1627_v35 = vld [vmem:[%s3804_s7 + $0x78] sm:$0xf] }
 0x150   : > { %v3859_v56 = vrot.slane %v1790_v19, 1  ;;  %v3865_v44 = vunpack.c.l.b16 %v1599_v1  ;;  %v1760_v13 = vshll.u32 %v3857_v18, 16  ;;  %v1705_v57 = vunpack.c.l.b16 %v1600_v47  ;;  %v1628_v51 = vld [vmem:[%s3804_s7 + $0x7c] sm:$0x1] }
 0x151   : > { %v3867_v31 = vrot.slane %v1820_v3, 1  ;;  %v3871_v22 = vpack.c.b16 %v1710_v8, %v3852_v15  ;;  %1906 = vrot.lane.b32.xlu1 %v3849_v24, %s2612_s8  ;;  %v1758_v9 = vor.u32 %v1757_v33, %v1753_v39  ;;  %v1802_v21 = vrot.slane %v1800_v29, 1  ;;  %v1611_v39 = vld [vmem:[%s3804_s7 + $0x38] sm:$0xf]  ;;  %v1612_v10 = vld [vmem:[%s3804_s7 + $0x3c] sm:$0x1] }
 0x152   : > { %v3877_v7 = vsel %vm1721_vm9, %v1788_v26, %v3859_v56  ;;  %v3886_v12 = vrot.slane %v1760_v13, 1  ;;  %v3890_v25 = vpack.c.b16 %v1705_v57, %v3865_v44  ;;  %v1725_v46 = vshll.u32 %v3863_v34, 16  ;;  %v3931_v57 = vld [vmem:[%s3804_s7 + $0x30] sm:$0xff] }
 0x153   : > { %1858 = vrot.lane.b32.xlu0 %v3877_v7, %s2613_s9  ;;  %v1805_v41 = vshll.u32 %v3871_v22, 16  ;;  %v1803_v54 = vor.u32 %v1802_v21, %v1798_v42  ;;  %v3894_v53 = vunpack.c.l.b16 %v1603_v2  ;;  %v1706_v0 = vunpack.c.l.b16 %v1604_v62 }
 0x154   : > { %v3899_v30 = vsel %vm1721_vm9, %v1818_v32, %v3867_v31  ;;  %v3903_v16 = vsel %vm1721_vm9, %v1758_v9, %v3886_v12  ;;  %v1723_v63 = vshrl.u32 %v3863_v34, 16  ;;  %v1730_v59 = vshll.u32 %v3890_v25, 16 }
 0x155   : > { %v3905_v40 = vrot.slane %v1805_v41, 1  ;;  %v3910_v49 = vpack.c.b16 %v1706_v0, %v3894_v53  ;;  %v1740_v50 = vshll.u32 %v3882_v43, 16  ;;  %v1680_v20 = vunpack.c.l.b16 %v1627_v35 }
 0x156   : > { %v1727_v5 = vrot.slane %v1725_v46, 1  ;;  %v1738_v23 = vshrl.u32 %v3882_v43, 16  ;;  %v1712_v55 = vunpack.c.l.b16 %v1628_v51  ;;  %v1828_v60 = vshrl.u32 %v3849_v24, 16 }
 0x157   : > { %v1808_v11 = vsel %vm1721_vm9, %v1803_v54, %v3905_v40  ;;  %v1742_v6 = vrot.slane %v1740_v50, 1  ;;  %v1745_v14 = vshll.u32 %v3910_v49, 16  ;;  %v1830_v42 = vshll.u32 %v3849_v24, 16 }
 0x158   : > { %1948 = vrot.lane.b32.xlu2 %v1808_v11, %s2614_s10  ;;  %v1720_v58 = vpack.c.b16 %v1712_v55, %v1680_v20  ;;  %v1728_v27 = vor.u32 %v1727_v5, %v1723_v63  ;;  %v1732_v47 = vrot.slane %v1730_v59, 1  ;;  %v3926_v8 = vunpack.c.l.b16 %v1611_v39  ;;  %v1632_v5 = vld [vmem:[%s3804_s7 + $0x8c] sm:$0x1] }
 0x159   : > { %1850 = vrot.lane.b32.xlu1 %v3903_v16, %s2613_s9  ;;  %v1832_v36 = vrot.slane %v1830_v42, 1  ;;  %v1743_v1 = vor.u32 %v1742_v6, %v1738_v23  ;;  %v1747_v26 = vrot.slane %v1745_v14, 1  ;;  %v1708_v33 = vunpack.c.l.b16 %v1612_v10 }
 0x15a   : > { %v1835_v19 = vshll.u32 %v1720_v58, 16  ;;  %v1733_v2 = vsel %vm1721_vm9, %v1728_v27, %v1732_v47  ;;  %v1770_v9 = vshll.u32 %v3931_v57, 16  ;;  %v1768_v21 = vshrl.u32 %v3931_v57, 16 }
 0x15b   : > { %1866 = vrot.lane.b32.xlu0 %v3899_v30, %s2613_s9  ;;  %v1833_v32 = vor.u32 %v1832_v36, %v1828_v60  ;;  %v1748_v29 = vsel %vm1721_vm9, %v1743_v1, %v1747_v26  ;;  %v3936_v62 = vpack.c.b16 %v1708_v33, %v3926_v8  ;;  %v1794_v0 = vshrl.u32 %v3834_v17, 16 }
 0x15c   : > { %v1837_v3 = vrot.slane %v1835_v19, 1  ;;  %v1772_v41 = vrot.slane %v1770_v9, 1  ;;  %v3952_v63 = vpack.c.b16 %v3852_v15, %v3852_v15  ;;  %v1824_v50 = vshrl.u32 %v3842_v4, 16 }
 0x15d   : > { %v1775_v35 = vshll.u32 %v3936_v62, 16  ;;  %v3955_v59 = vor.u32 %v1794_v0, %v3859_v56  ;;  %v1839_v15 = vshrl.u32 %v1720_v58, 16  ;;  %v1631_v56 = vld [vmem:[%s3804_s7 + $0x88] sm:$0xf]  ;;  %v1915_v23 = vunpack.c.l.b16 %v1632_v5 }
 0x15e   : > { %v1838_v13 = vsel %vm1721_vm9, %v1833_v32, %v1837_v3  ;;  %v1773_v54 = vor.u32 %v1772_v41, %v1768_v21  ;;  %v3964_v17 = vor.u32 %v1824_v50, %v3867_v31  ;;  %v3973_v4 = vunpack.c.l.b16 %v1631_v56 }
 0x15f   : > { %v1777_v46 = vrot.slane %v1775_v35, 1  ;;  %v1841_v55 = vor.u32 %v1839_v15, %v1837_v3  ;;  %v3975_v6 = vpack.c.b16 %v1680_v20, %v1680_v20  ;;  %v1809_v31 = vshrl.u32 %v3871_v22, 16 }
 0x160   : > { %1956 = vrot.lane.b32.xlu2 %v1838_v13, %s2614_s10  ;;  %v3981_v60 = vpack.c.b16 %v1915_v23, %v3973_v4  ;;  %v1749_v22 = vshrl.u32 %v3910_v49, 16  ;;  %v1734_v1 = vshrl.u32 %v3890_v25, 16  ;;  %v3997_v27 = vpack.c.b16 %v3894_v53, %v3894_v53  ;;  %v2484_v53 = vld [vmem:[%s4231_s1 + $0x8] sm:$0xff] }
 0x161   : > { %1932 = vrot.lane.b32.xlu1 %v1748_v29, %s2614_s10  ;;  %v1778_v51 = vsel %vm1721_vm9, %v1773_v54, %v1777_v46  ;;  %v1811_v42 = vor.u32 %v1809_v31, %v3905_v40  ;;  %v1764_v3 = vshrl.u32 %v3857_v18, 16  ;;  %v1779_v25 = vshrl.u32 %v3936_v62, 16  ;;  %v2485_v18 = vld [vmem:[%s4231_s1 + $0x10] sm:$0xff] }
 0x162   : > { %v1925_v20 = vshll.u32 %v3981_v60, 16  ;;  %v1751_v19 = vor.u32 %v1749_v22, %v1747_v26  ;;  %v1736_v32 = vor.u32 %v1734_v1, %v1732_v47  ;;  %2487 = vmatpush.bf16.msra.mxu2 %v2485_v18  ;;  %2488 = vmatpush.bf16.msra.mxu3 %v2485_v18  ;;  %v4018_v49 = vpack.c.b16 %v3926_v8, %v3926_v8  ;;  %v2483_v26 = vld [vmem:[%s4231_s1] sm:$0xff] }
 0x163   : > { %1842 = vrot.lane.b32.xlu0 %v1733_v2, %s2613_s9  ;;  %2193 = vmatpush.bf16.msra.mxu0 %v2485_v18  ;;  %v1694_v8 = vpack.c.b16 %v3825_v61, %v3825_v61  ;;  %v1881_v33 = vpack.c.b16 %v3973_v4, %v3973_v4  ;;  %v4050_v62 = vpack.c.b16 %v3837_v28, %v3837_v28 }
 0x164   : > { %v1927_v10 = vrot.slane %v1925_v20, 1  ;;  %2486 = vmatpush.bf16.msra.mxu1 %v2485_v18  ;;  %v1690_v35 = vpack.c.b16 %v3814_v52, %v3814_v52 }
 0x166   : > { %2490 = vmatpush.bf16.msra.mxu2 %v2484_v53  ;;  %2491 = vmatpush.bf16.msra.mxu3 %v2484_v53 }
 0x167   : > { %2194 = vmatpush.bf16.msra.mxu0 %v2484_v53 }
 0x168   : > { %1882 = vrot.lane.b32.xlu2 %v3882_v43, %s2612_s8  ;;  %2489 = vmatpush.bf16.msra.mxu1 %v2484_v53 }
 0x169   : > { %1862 = vrot.lane.b32.xlu1 %v1808_v11, %s2613_s9  ;;  %v2482_v11 = vld [vmem:[%s3804_s7 + $0x80] sm:$0xff] }
 0x16a   : > { %v1920_v14 = vshll.u32 %v2482_v11, 16  ;;  %v1918_v58 = vshrl.u32 %v2482_v11, 16  ;;  %2493 = vmatpush.bf16.msra.mxu2 %v2483_v26  ;;  %2494 = vmatpush.bf16.msra.mxu3 %v2483_v26 }
 0x16b   : > { %1890 = vrot.lane.b32.xlu0 %v3931_v57, %s2612_s8  ;;  %2195 = vmatpush.bf16.msra.mxu0 %v2483_v26 }
 0x16c   : > { %v1922_v36 = vrot.slane %v1920_v14, 1  ;;  %2492 = vmatpush.bf16.msra.mxu1 %v2483_v26 }
 0x16e   : > { %v1923_v39 = vor.u32 %v1922_v36, %v1918_v58 }
 0x170   : > { %1940 = vrot.lane.b32.xlu2 %v1778_v51, %s2614_s10  ;;  %v1928_v40 = vsel %vm1721_vm9, %v1923_v39, %v1927_v10 }
 0x171   : > { %1900 = vrot.lane.b32.xlu1 %v3952_v63, %s2612_s8 }
 0x173   : > { %1860 = vrot.lane.b32.xlu0 %v3955_v59, %s2613_s9 }
 0x178   : > { %1868 = vrot.lane.b32.xlu2 %v3964_v17, %s2613_s9 }
 0x179   : > { %1910 = vrot.lane.b32.xlu1 %v2482_v11, %s2612_s8 }
 0x17b   : > { %1870 = vrot.lane.b32.xlu0 %v1838_v13, %s2613_s9 }
 0x180   : > { %1902 = vrot.lane.b32.xlu2 %v3817_v37, %s2612_s8 }
 0x181   : > { %1958 = vrot.lane.b32.xlu1 %v1841_v55, %s2614_s10 }
 0x183   : > { %1908 = vrot.lane.b32.xlu0 %v3975_v6, %s2612_s8 }
 0x188   : > { %1950 = vrot.lane.b32.xlu2 %v1811_v42, %s2614_s10 }
 0x189   : > { %1846 = vrot.lane.b32.xlu1 %v1748_v29, %s2613_s9  ;;  %v1929_v29 = vshrl.u32 %v3981_v60, 16 }
 0x18b   : > { %1952 = vrot.lane.b32.xlu0 %v3899_v30, %s2614_s10  ;;  %v1766_v30 = vor.u32 %v1764_v3, %v3886_v12  ;;  %v1781_v12 = vor.u32 %v1779_v25, %v1777_v46  ;;  %v1931_v13 = vor.u32 %v1929_v29, %v1927_v10 }
 0x190   : > { %1960 = vrot.lane.b32.xlu2 %v1928_v40, %s2614_s10 }
 0x191   : > { %1884 = vrot.lane.b32.xlu1 %v3997_v27, %s2612_s8 }
 0x193   : > { %1844 = vrot.lane.b32.xlu0 %v1736_v32, %s2613_s9 }
 0x198   : > { %1852 = vrot.lane.b32.xlu2 %v1766_v30, %s2613_s9 }
 0x199   : > { %1894 = vrot.lane.b32.xlu1 %v3810_v48, %s2612_s8 }
 0x19b   : > { %1854 = vrot.lane.b32.xlu0 %v1778_v51, %s2613_s9 }
 0x1a0   : > { %1886 = vrot.lane.b32.xlu2 %v3830_v38, %s2612_s8 }
 0x1a1   : > { %1942 = vrot.lane.b32.xlu1 %v1781_v12, %s2614_s10 }
 0x1a3   : > { %1892 = vrot.lane.b32.xlu0 %v4018_v49, %s2612_s8 }
 0x1a8   : > { %1934 = vrot.lane.b32.xlu2 %v1751_v19, %s2614_s10 }
 0x1a9   : > { %1872 = vrot.lane.b32.xlu1 %v1841_v55, %s2613_s9 }
 0x1ab   : > { %1936 = vrot.lane.b32.xlu0 %v3903_v16, %s2614_s10 }
 0x1b0   : > { %1944 = vrot.lane.b32.xlu2 %v3877_v7, %s2614_s10 }
 0x1b1   : > { %1954 = vrot.lane.b32.xlu1 %v3964_v17, %s2614_s10 }
 0x1b2   : > { %v1949_v47 = vpop.permute.xlu2 %1948 }
 0x1b3   : > { %1864 = vrot.lane.b32.xlu0 %v1811_v42, %s2613_s9 }
 0x1b8   : > { %1904 = vrot.lane.b32.xlu2 %v1694_v8, %s2612_s8 }
 0x1b9   : > { %1856 = vrot.lane.b32.xlu1 %v1781_v12, %s2613_s9 }
 0x1ba   : > { %v1957_v16 = vpop.permute.xlu2 %1956 }
 0x1bb   : > { %1912 = vrot.lane.b32.xlu0 %v1881_v33, %s2612_s8  ;;  %v1899_v7 = vpop.permute.xlu1 %1898 }
 0x1c0   : > { %1962 = vrot.lane.b32.xlu2 %v1931_v13, %s2614_s10 }
 0x1c1   : > { %1938 = vrot.lane.b32.xlu1 %v1766_v30, %s2614_s10 }
 0x1c2   : > { %v1883_v2 = vpop.permute.xlu2 %1882 }
 0x1c3   : > { %1848 = vrot.lane.b32.xlu0 %v1751_v19, %s2613_s9  ;;  %v1907_v61 = vpop.permute.xlu1 %1906 }
 0x1c5   : > { %v1859_v9 = vpop.permute.xlu0 %1858 }
 0x1c6   : > { %v1986_v21 = vsel %vm1964_vm10, %v3810_v48, %v1859_v9 }
 0x1c7   : > { %v2023_v41 = vsel %vm2005_vm11, %v1986_v21, %v1899_v7 }
 0x1c8   : > { %v2056_v54 = vsel %vm2038_vm12, %v2023_v41, %v1949_v47  ;;  %1888 = vrot.lane.b32.xlu2 %v4050_v62, %s2612_s8 }
 0x1c9   : > { %2464 = vmatmul.msk.bf16.vlgmr.msra.gmra.mxu2 %vm2151_vm13, %v2056_v54 }
 0x1ca   : > { %v1941_v28 = vpop.permute.xlu2 %1940 }
 0x1cb   : > { %1896 = vrot.lane.b32.xlu0 %v1690_v35, %s2612_s8  ;;  %v1851_v46 = vpop.permute.xlu1 %1850 }
 0x1cc   : > { %v1976_v23 = vsel %vm1964_vm10, %v3830_v38, %v1851_v46 }
 0x1cd   : > { %v1867_v0 = vpop.permute.xlu0 %1866 }
 0x1ce   : > { %v1996_v48 = vsel %vm1964_vm10, %v3817_v37, %v1867_v0 }
 0x1cf   : > { %v2031_v51 = vsel %vm2005_vm11, %v1996_v48, %v1907_v61 }
 0x1d0   : > { %v2064_v50 = vsel %vm2038_vm12, %v2031_v51, %v1957_v16  ;;  %1946 = vrot.lane.b32.xlu2 %v3955_v59, %s2614_s10 }
 0x1d1   : > { %2467 = vmatmul.msk.bf16.vlgmr.msra.gmra.mxu3 %vm2151_vm13, %v2064_v50 }
 0x1d2   : > { %v1869_v52 = vpop.permute.xlu2 %1868 }
 0x1d3   : > { %v1933_v17 = vpop.permute.xlu1 %1932  ;;  %v1999_v22 = vsel %vm1964_vm10, %v1694_v8, %v1869_v52 }
 0x1d5   : > { %v1843_v11 = vpop.permute.xlu0 %1842 }
 0x1d6   : > { %v1966_v15 = vsel %vm1964_vm10, %v3863_v34, %v1843_v11 }
 0x1d7   : > { %v2007_v56 = vsel %vm2005_vm11, %v1966_v15, %v1883_v2 }
 0x1d8   : > { %v2040_v5 = vsel %vm2038_vm12, %v2007_v56, %v1933_v17 }
 0x1d9   : > { %2458 = vmatmul.msk.bf16.vlgmr.msra.gmra.mxu0 %vm2151_vm13, %v2040_v5 }
 0x1da   : > { %v1903_v37 = vpop.permute.xlu2 %1902 }
 0x1db   : > { %v1863_v4 = vpop.permute.xlu1 %1862 }
 0x1dc   : > { %v1991_v18 = vsel %vm1964_vm10, %v3807_v45, %v1863_v4 }
 0x1dd   : > { %v1891_v59 = vpop.permute.xlu0 %1890  ;;  %v2027_v47 = vsel %vm2005_vm11, %v1991_v18, %v1903_v37 }
 0x1de   : > { %v2015_v55 = vsel %vm2005_vm11, %v1976_v23, %v1891_v59 }
 0x1df   : > { %v2048_v31 = vsel %vm2038_vm12, %v2015_v55, %v1941_v28 }
 0x1e0   : > { %2461 = vmatmul.msk.bf16.vlgmr.msra.gmra.mxu1 %vm2151_vm13, %v2048_v31 }
 0x1e2   : > { %v1951_v14 = vpop.permute.xlu2 %1950 }
 0x1e3   : > { %v1901_v34 = vpop.permute.xlu1 %1900 }
 0x1e5   : > { %v1861_v60 = vpop.permute.xlu0 %1860 }
 0x1e6   : > { %v1989_v40 = vsel %vm1964_vm10, %v1690_v35, %v1861_v60  ;;  %v1682_v35 = vpack.c.b16 %v3865_v44, %v3865_v44 }
 0x1ea   : > { %v1961_v42 = vpop.permute.xlu2 %1960 }
 0x1eb   : > { %v1911_v58 = vpop.permute.xlu1 %1910 }
 0x1ed   : > { %v1871_v36 = vpop.permute.xlu0 %1870 }
 0x1ee   : > { %v2001_v20 = vsel %vm1964_vm10, %v3849_v24, %v1871_v36  ;;  %v2025_v24 = vsel %vm2005_vm11, %v1989_v40, %v1901_v34 }
 0x1ef   : > { %v2035_v39 = vsel %vm2005_vm11, %v2001_v20, %v1911_v58  ;;  %v2058_v12 = vsel %vm2038_vm12, %v2025_v24, %v1951_v14 }
 0x1f0   : > { %v4084_v1 = vsel %vm2038_vm12, %v2035_v39, %v1961_v42  ;;  %v2101_v16 = vunpack.c.l.b16 %v2058_v12 }
 0x1f1   : > { %v2108_v30 = vunpack.c.l.b16 %v4084_v1 }
 0x1f2   : > { %v1853_v38 = vpop.permute.xlu2 %1852 }
 0x1f3   : > { %v1959_v10 = vpop.permute.xlu1 %1958  ;;  %v1979_v0 = vsel %vm1964_vm10, %v4050_v62, %v1853_v38 }
 0x1f5   : > { %v1909_v19 = vpop.permute.xlu0 %1908 }
 0x1f6   : > { %v2033_v32 = vsel %vm2005_vm11, %v1999_v22, %v1909_v19 }
 0x1f7   : > { %v2066_v3 = vsel %vm2038_vm12, %v2033_v32, %v1959_v10 }
 0x1f8   : > { %v2107_v25 = vunpack.c.l.b16 %v2066_v3 }
 0x1fa   : > { %v2131_v53 = vpack.c.b16 %v2108_v30, %v2107_v25  ;;  %v1887_v29 = vpop.permute.xlu2 %1886 }
 0x1fb   : > { %v1847_v26 = vpop.permute.xlu1 %1846 }
 0x1fc   : > { %2468 = vmatmul.msk.bf16.gmra.mxu3 %vm2151_vm13, %v2131_v53  ;;  %v1971_v15 = vsel %vm1964_vm10, %v3882_v43, %v1847_v26 }
 0x1fd   : > { %v1953_v8 = vpop.permute.xlu0 %1952  ;;  %v2011_v37 = vsel %vm2005_vm11, %v1971_v15, %v1887_v29 }
 0x1fe   : > { %v2060_v33 = vsel %vm2038_vm12, %v2027_v47, %v1953_v8 }
 0x1ff   : > { %v2102_v7 = vunpack.c.l.b16 %v2060_v33  ;;  %v2103_v20 = vunpack.c.h.b16 %v2060_v33 }
 0x201   : > { %v2128_v13 = vpack.c.b16 %v2102_v7, %v2101_v16 }
 0x202   : > { %v1935_v45 = vpop.permute.xlu2 %1934 }
 0x203   : > { %2465 = vmatmul.msk.bf16.gmra.mxu2 %vm2151_vm13, %v2128_v13  ;;  %v1885_v2 = vpop.permute.xlu1 %1884 }
 0x205   : > { %v1845_v61 = vpop.permute.xlu0 %1844 }
 0x206   : > { %v1969_v50 = vsel %vm1964_vm10, %v1682_v35, %v1845_v61  ;;  %v4141_v61 = vld [vmem:[%s4232_s2] ss:$0 sm:$0xff] }
 0x207   : > { %v2009_v44 = vsel %vm2005_vm11, %v1969_v50, %v1885_v2 }
 0x208   : > { %v2042_v5 = vsel %vm2038_vm12, %v2009_v44, %v1935_v45 }
 0x209   : > { %v2089_v55 = vunpack.c.l.b16 %v2042_v5 }
 0x20a   : > { %v1945_v28 = vpop.permute.xlu2 %1944 }
 0x20b   : > { %v1895_v9 = vpop.permute.xlu1 %1894 }
 0x20d   : > { %v1855_v21 = vpop.permute.xlu0 %1854 }
 0x20e   : > { %v1981_v41 = vsel %vm1964_vm10, %v3931_v57, %v1855_v21 }
 0x20f   : > { %v2019_v54 = vsel %vm2005_vm11, %v1981_v41, %v1895_v9 }
 0x210   : > { %v2052_v48 = vsel %vm2038_vm12, %v2019_v54, %v1945_v28 }
 0x211   : > { %v2096_v57 = vunpack.c.l.b16 %v2052_v48 }
 0x212   : > { %v1905_v59 = vpop.permute.xlu2 %1904 }
 0x213   : > { %v1943_v46 = vpop.permute.xlu1 %1942 }
 0x215   : > { %v1893_v51 = vpop.permute.xlu0 %1892 }
 0x216   : > { %v2017_v52 = vsel %vm2005_vm11, %v1979_v0, %v1893_v51 }
 0x217   : > { %v2050_v17 = vsel %vm2038_vm12, %v2017_v52, %v1943_v46 }
 0x218   : > { %v2095_v11 = vunpack.c.l.b16 %v2050_v17 }
 0x21a   : > { %v2125_v56 = vpack.c.b16 %v2096_v57, %v2095_v11  ;;  %v1963_v36 = vpop.permute.xlu2 %1962 }
 0x21b   : > { %v1873_v62 = vpop.permute.xlu1 %1872 }
 0x21c   : > { %2462 = vmatmul.msk.bf16.gmra.mxu1 %vm2151_vm13, %v2125_v56  ;;  %v2004_v22 = vsel %vm1964_vm10, %v3975_v6, %v1873_v62 }
 0x21d   : > { %v1937_v4 = vpop.permute.xlu0 %1936 }
 0x21e   : > { %v2044_v23 = vsel %vm2038_vm12, %v2011_v37, %v1937_v4 }
 0x21f   : > { %v2090_v31 = vunpack.c.l.b16 %v2044_v23  ;;  %v2091_v26 = vunpack.c.h.b16 %v2044_v23 }
 0x221   : > { %v2122_v14 = vpack.c.b16 %v2090_v31, %v2089_v55 }
 0x222   : > { %v1889_v25 = vpop.permute.xlu2 %1888 }
 0x223   : > { %2459 = vmatmul.msk.bf16.gmra.mxu0 %vm2151_vm13, %v2122_v14  ;;  %v1955_v34 = vpop.permute.xlu1 %1954 }
 0x225   : > { %v1865_v60 = vpop.permute.xlu0 %1864 }
 0x226   : > { %v1994_v43 = vsel %vm1964_vm10, %v3952_v63, %v1865_v60  ;;  %v2109_v63 = vunpack.c.h.b16 %v4084_v1 }
 0x227   : > { %v2029_v42 = vsel %vm2005_vm11, %v1994_v43, %v1905_v59 }
 0x228   : > { %v2062_v58 = vsel %vm2038_vm12, %v2029_v42, %v1955_v34 }
 0x229   : > { %v2104_v39 = vunpack.c.l.b16 %v2062_v58 }
 0x22a   : > { %v1947_v33 = vpop.permute.xlu2 %1946 }
 0x22b   : > { %v2129_v10 = vpack.c.b16 %v2104_v39, %v2103_v20  ;;  %v1857_v38 = vpop.permute.xlu1 %1856 }
 0x22c   : > { %v1984_v1 = vsel %vm1964_vm10, %v4018_v49, %v1857_v38 }
 0x22d   : > { %2466 = vmatmul.msk.bf16.gmra.mxu2 %vm2151_vm13, %v2129_v10  ;;  %v1913_v19 = vpop.permute.xlu0 %1912 }
 0x22e   : > { %v2037_v40 = vsel %vm2005_vm11, %v2004_v22, %v1913_v19 }
 0x22f   : > { %v2070_v32 = vsel %vm2038_vm12, %v2037_v40, %v1963_v36 }
 0x230   : > { %v2110_v3 = vunpack.c.l.b16 %v2070_v32 }
 0x232   : > { %v2132_v30 = vpack.c.b16 %v2110_v3, %v2109_v63 }
 0x233   : > { %v1939_v18 = vpop.permute.xlu1 %1938 }
 0x234   : > { %2469 = vmatmul.msk.bf16.gmra.mxu3 %vm2151_vm13, %v2132_v30 }
 0x235   : > { %v1849_v24 = vpop.permute.xlu0 %1848 }
 0x236   : > { %v1974_v53 = vsel %vm1964_vm10, %v3997_v27, %v1849_v24  ;;  %v2097_v27 = vunpack.c.h.b16 %v2052_v48 }
 0x237   : > { %v2013_v6 = vsel %vm2005_vm11, %v1974_v53, %v1889_v25 }
 0x238   : > { %v2046_v12 = vsel %vm2038_vm12, %v2013_v6, %v1939_v18 }
 0x239   : > { %v2092_v47 = vunpack.c.l.b16 %v2046_v12 }
 0x23b   : > { %v2123_v8 = vpack.c.b16 %v2092_v47, %v2091_v26 }
 0x23d   : > { %2460 = vmatmul.msk.bf16.gmra.mxu0 %vm2151_vm13, %v2123_v8  ;;  %v1897_v29 = vpop.permute.xlu0 %1896 }
 0x23e   : > { %v2021_v16 = vsel %vm2005_vm11, %v1984_v1, %v1897_v29 }
 0x23f   : > { %v2054_v7 = vsel %vm2038_vm12, %v2021_v16, %v1947_v33 }
 0x240   : > { %v2098_v13 = vunpack.c.l.b16 %v2054_v7 }
 0x242   : > { %v2126_v2 = vpack.c.b16 %v2098_v13, %v2097_v27 }
 0x244   : > { %2463 = vmatmul.msk.bf16.gmra.mxu1 %vm2151_vm13, %v2126_v2 }
 0x24c   : > { %v2227_v49 = vpop.f32.mrf.mxu2 }
 0x24d   : > { %v2228_v45 = vadd.f32 %v4141_v61, %v2227_v49 }
 0x24f   : > { %v2269_v9 = vpack.c.bf16 %v2228_v45, %v2228_v45 }
 0x251   : > { %2294 = vst.msk [vmem:[%s2676_s30 + $0x30] sm:$0xf] %vm2281_vm14, %v2269_v9 }
 0x254   : > { %v2229_v21 = vpop.f32.mrf.mxu2  ;;  %v2242_v41 = vpop.f32.mrf.mxu3 }
 0x255   : > { %v2230_v35 = vadd.f32 %v4141_v61, %v2229_v21  ;;  %v2243_v54 = vadd.f32 %v4141_v61, %v2242_v41 }
 0x256   : > { %v2197_v28 = vpop.f32.mrf.mxu0 }
 0x257   : > { %v2270_v46 = vpack.c.bf16 %v2230_v35, %v2230_v35  ;;  %v2275_v0 = vpack.c.bf16 %v2243_v54, %v2243_v54  ;;  %v2198_v48 = vadd.f32 %v4141_v61, %v2197_v28 }
 0x259   : > { %2295 = vst.msk [vmem:[%s2676_s30 + $0x34] sm:$0xf] %vm2281_vm14, %v2270_v46  ;;  %v2257_v51 = vpack.c.bf16 %v2198_v48, %v2198_v48 }
 0x25a   : > { %2300 = vst.msk [vmem:[%s2676_s30 + $0x48] sm:$0xf] %vm2281_vm14, %v2275_v0 }
 0x25b   : > { %2282 = vst.msk [vmem:[%s2676_s30] sm:$0xf] %vm2281_vm14, %v2257_v51 }
 0x25c   : > { %v2244_v50 = vpop.f32.mrf.mxu3 }
 0x25d   : > { %v2245_v52 = vadd.f32 %v4141_v61, %v2244_v50  ;;  %v2212_v17 = vpop.f32.mrf.mxu1 }
 0x25e   : > { %v2213_v57 = vadd.f32 %v4141_v61, %v2212_v17  ;;  %v2199_v11 = vpop.f32.mrf.mxu0 }
 0x25f   : > { %v2276_v44 = vpack.c.bf16 %v2245_v52, %v2245_v52  ;;  %v2200_v15 = vadd.f32 %v4141_v61, %v2199_v11 }
 0x260   : > { %v2263_v56 = vpack.c.bf16 %v2213_v57, %v2213_v57 }
 0x261   : > { %2301 = vst.msk [vmem:[%s2676_s30 + $0x4c] sm:$0xf] %vm2281_vm14, %v2276_v44  ;;  %v2258_v5 = vpack.c.bf16 %v2200_v15, %v2200_v15 }
 0x262   : > { %2288 = vst.msk [vmem:[%s2676_s30 + $0x18] sm:$0xf] %vm2281_vm14, %v2263_v56 }
 0x263   : > { %2283 = vst.msk [vmem:[%s2676_s30 + $0x4] sm:$0xf] %vm2281_vm14, %v2258_v5 }
 0x265   : > { %v2214_v62 = vpop.f32.mrf.mxu1 }
 0x266   : > { %v2215_v37 = vadd.f32 %v4141_v61, %v2214_v62 }
 0x268   : > { %v2264_v4 = vpack.c.bf16 %v2215_v37, %v2215_v37 }
 0x26a   : > { %2289 = vst.msk [vmem:[%s2676_s30 + $0x1c] sm:$0xf] %vm2281_vm14, %v2264_v4 }
 0x27f   : > { %v2247_v23 = vpop.f32.mrf.mxu3 }
 0x280   : > { %v2248_v59 = vadd.f32 %v4141_v61, %v2247_v23 }
 0x282   : > { %v2277_v55 = vpack.c.bf16 %v2248_v59, %v2248_v59 }
 0x284   : > { %2302 = vst.msk [vmem:[%s2676_s30 + $0x50] sm:$0xf] %vm2281_vm14, %v2277_v55 }
 0x286   : > { %v2232_v31 = vpop.f32.mrf.mxu2 }
 0x287   : > { %v2233_v14 = vadd.f32 %v4141_v61, %v2232_v31  ;;  %v2249_v34 = vpop.f32.mrf.mxu3 }
 0x288   : > { %v2250_v60 = vadd.f32 %v4141_v61, %v2249_v34 }
 0x289   : > { %v2271_v43 = vpack.c.bf16 %v2233_v14, %v2233_v14 }
 0x28a   : > { %v2278_v42 = vpack.c.bf16 %v2250_v60, %v2250_v60 }
 0x28b   : > { %2296 = vst.msk [vmem:[%s2676_s30 + $0x38] sm:$0xf] %vm2281_vm14, %v2271_v43 }
 0x28c   : > { %2303 = vst.msk [vmem:[%s2676_s30 + $0x54] sm:$0xf] %vm2281_vm14, %v2278_v42 }
 0x28e   : > { %v2234_v58 = vpop.f32.mrf.mxu2 }
 0x28f   : > { %v2235_v36 = vadd.f32 %v4141_v61, %v2234_v58 }
 0x291   : > { %v2272_v20 = vpack.c.bf16 %v2235_v36, %v2235_v36 }
 0x293   : > { %2297 = vst.msk [vmem:[%s2676_s30 + $0x3c] sm:$0xf] %vm2281_vm14, %v2272_v20 }
 0x299   : > { %v2217_v39 = vpop.f32.mrf.mxu1 }
 0x29a   : > { %v2218_v10 = vadd.f32 %v4141_v61, %v2217_v39 }
 0x29c   : > { %v2265_v38 = vpack.c.bf16 %v2218_v10, %v2218_v10 }
 0x29e   : > { %2290 = vst.msk [vmem:[%s2676_s30 + $0x20] sm:$0xf] %vm2281_vm14, %v2265_v38 }
 0x2a0   : > { %v2202_v22 = vpop.f32.mrf.mxu0 }
 0x2a1   : > { %v2203_v19 = vadd.f32 %v4141_v61, %v2202_v22  ;;  %v2219_v40 = vpop.f32.mrf.mxu1 }
 0x2a2   : > { %v2220_v32 = vadd.f32 %v4141_v61, %v2219_v40 }
 0x2a3   : > { %v2259_v63 = vpack.c.bf16 %v2203_v19, %v2203_v19 }
 0x2a4   : > { %v2266_v3 = vpack.c.bf16 %v2220_v32, %v2220_v32 }
 0x2a5   : > { %2284 = vst.msk [vmem:[%s2676_s30 + $0x8] sm:$0xf] %vm2281_vm14, %v2259_v63 }
 0x2a6   : > { %2291 = vst.msk [vmem:[%s2676_s30 + $0x24] sm:$0xf] %vm2281_vm14, %v2266_v3 }
 0x2a8   : > { %v2204_v30 = vpop.f32.mrf.mxu0 }
 0x2a9   : > { %v2205_v25 = vadd.f32 %v4141_v61, %v2204_v30 }
 0x2ab   : > { %v2260_v24 = vpack.c.bf16 %v2205_v25, %v2205_v25 }
 0x2ad   : > { %2285 = vst.msk [vmem:[%s2676_s30 + $0xc] sm:$0xf] %vm2281_vm14, %v2260_v24 }
 0x2b0   : > { %v2237_v18 = vpop.f32.mrf.mxu2 }
 0x2b1   : > { %v2238_v53 = vadd.f32 %v4141_v61, %v2237_v18 }
 0x2b3   : > { %v2273_v6 = vpack.c.bf16 %v2238_v53, %v2238_v53 }
 0x2b5   : > { %2298 = vst.msk [vmem:[%s2676_s30 + $0x40] sm:$0xf] %vm2281_vm14, %v2273_v6 }
 0x2b7   : > { %v2252_v12 = vpop.f32.mrf.mxu3 }
 0x2b8   : > { %v2253_v26 = vadd.f32 %v4141_v61, %v2252_v12  ;;  %v2239_v47 = vpop.f32.mrf.mxu2 }
 0x2b9   : > { %v2240_v8 = vadd.f32 %v4141_v61, %v2239_v47 }
 0x2ba   : > { %v2279_v33 = vpack.c.bf16 %v2253_v26, %v2253_v26  ;;  %v2207_v1 = vpop.f32.mrf.mxu0 }
 0x2bb   : > { %v2274_v29 = vpack.c.bf16 %v2240_v8, %v2240_v8  ;;  %v2208_v16 = vadd.f32 %v4141_v61, %v2207_v1 }
 0x2bc   : > { %2304 = vst.msk [vmem:[%s2676_s30 + $0x58] sm:$0xf] %vm2281_vm14, %v2279_v33 }
 0x2bd   : > { %2299 = vst.msk [vmem:[%s2676_s30 + $0x44] sm:$0xf] %vm2281_vm14, %v2274_v29  ;;  %v2261_v7 = vpack.c.bf16 %v2208_v16, %v2208_v16 }
 0x2bf   : > { %2286 = vst.msk [vmem:[%s2676_s30 + $0x10] sm:$0xf] %vm2281_vm14, %v2261_v7  ;;  %v2254_v27 = vpop.f32.mrf.mxu3 }
 0x2c0   : > { %v2255_v13 = vadd.f32 %v4141_v61, %v2254_v27 }
 0x2c1   : > { %v2222_v2 = vpop.f32.mrf.mxu1 }
 0x2c2   : > { %v2280_v49 = vpack.c.bf16 %v2255_v13, %v2255_v13  ;;  %v2223_v45 = vadd.f32 %v4141_v61, %v2222_v2  ;;  %v2209_v9 = vpop.f32.mrf.mxu0 }
 0x2c3   : > { %v2210_v21 = vadd.f32 %v4141_v61, %v2209_v9 }
 0x2c4   : > { %2305 = vst.msk [vmem:[%s2676_s30 + $0x5c] sm:$0xf] %vm2281_vm14, %v2280_v49  ;;  %v2267_v41 = vpack.c.bf16 %v2223_v45, %v2223_v45 }
 0x2c5   : > { %v2262_v35 = vpack.c.bf16 %v2210_v21, %v2210_v21 }
 0x2c6   : > { %2292 = vst.msk [vmem:[%s2676_s30 + $0x28] sm:$0xf] %vm2281_vm14, %v2267_v41 }
 0x2c7   : > { %2287 = vst.msk [vmem:[%s2676_s30 + $0x14] sm:$0xf] %vm2281_vm14, %v2262_v35 }
 0x2c9   : > { %v2224_v54 = vpop.f32.mrf.mxu1 }
 0x2ca   : > { %v2225_v28 = vadd.f32 %v4141_v61, %v2224_v54 }
 0x2cc   : > { %v2268_v46 = vpack.c.bf16 %v2225_v28, %v2225_v28 }
 0x2ce   : > { %2293 = vst.msk [vmem:[%s2676_s30 + $0x2c] sm:$0xf] %vm2281_vm14, %v2268_v46 }
 0x2cf PF: > { %s13_s16 = sadd.s32 1, %s2605_s16   ;;  %s4308_s12 = smov %s2597_s14 }
 0x2d0   : > { %p10_p8 = scmp.ge.s32.totalorder %s13_s16, 6   ;;  %s4309_s13 = smov %s2601_s15 }
 0x2d1   : > { %s4310_s14 = smov %s4313_s17  ;;  %s4311_s15 = smov %s4317_s18 }
 0x2d2   :  { %12 = sbr.rel (!%p10_p8) target bundleno = 3 (0x3), region = 67 }

</bundles_post_ra>
